<compile_context>
chip_gen: v7x
topology: tpu7x:2x2x1
jax: 0.10.0
libtpu: 0.0.40
codegen_flags: <defaults>
</compile_context>

<pallas_src>
import functools

import jax
import jax.numpy as jnp
from jax.experimental import pallas as pl
from jax.experimental.pallas import tpu as pltpu

BN_EPS = 1e-5
NORM_EPS = 1e-7


def _round_up(v, m):
    return (v + m - 1) // m * m


# ---------------------------------------------------------------------------
# Fused forward kernel (one grid step per batch tile)
# ---------------------------------------------------------------------------
def _disc_kernel(xf_ref, ex_ref,
                 w1_ref, b1_ref,
                 w2_ref, b2_ref,
                 wf_ref, wfe_ref, bf_ref,
                 wh_ref, bh_ref,
                 wq_ref, bq_ref,
                 out_ref, *, latent_dim, q_head_in):
    def mm(a, w_ref):
        # bf16 operands, f32 accumulation on the MXU.
        return jnp.dot(a.astype(w_ref.dtype), w_ref[...],
                       preferred_element_type=jnp.float32)

    def leaky(v):
        return jnp.where(v >= 0.0, v, 0.2 * v)

    xf = xf_ref[...].astype(jnp.float32)          # (tm, H*W)
    ex = ex_ref[...].astype(jnp.float32)          # (tm, extra_k)  raw conds/ds

    # conv1 + BN1 (folded) + LeakyReLU        cols: w1*64 + c
    y1 = leaky(mm(xf, w1_ref) + b1_ref[...])
    # conv2 + BN2 (folded) + LeakyReLU        cols: w2*128 + c
    y2 = leaky(mm(y1, w2_ref) + b2_ref[...])
    # post_conv_fc (Normalizer folded into extras path) + BNf + LeakyReLU
    h = leaky(mm(y2, wf_ref) + mm(ex, wfe_ref) + bf_ref[...])
    # fused heads: cols [0:128] = q_fc pre-activation, col [128] = d_out
    hd = mm(h, wh_ref) + bh_ref[...]
    qi = leaky(hd[:, :q_head_in])
    d = hd[:, q_head_in:q_head_in + 1]
    # fused q heads: [q_mean | q_logstd], clamp only the logstd half
    q = mm(qi, wq_ref) + bq_ref[...]
    col = jax.lax.broadcasted_iota(jnp.int32, q.shape, 1)
    q = jnp.where(col >= latent_dim, jnp.maximum(q, jnp.float32(-16.0)), q)

    out_ref[:, 0:1] = d
    out_ref[:, 1:] = q


# ---------------------------------------------------------------------------
# Raw (PyTorch-like) parameters
# ---------------------------------------------------------------------------
def init_params(key, latent_dim, n_design_scalars, num_conds, design_shape):
    H, W = design_shape
    w1 = (W + 2 - 4) // 2 + 1
    w2 = (w1 + 2 - 4) // 2 + 1
    flat_dim = 128 * 1 * w2

    ks = jax.random.split(key, 30)
    n = lambda k, shape, s=0.1: s * jax.random.normal(k, shape, jnp.float32)
    u = lambda k, shape: jax.random.uniform(k, shape, jnp.float32, 0.5, 1.5)

    return {
        "conv1_w": n(ks[0], (64, 1, 2, 4)), "conv1_b": n(ks[1], (64,)),
        "bn1_g": u(ks[2], (64,)), "bn1_b": n(ks[3], (64,)),
        "bn1_m": n(ks[4], (64,)), "bn1_v": u(ks[5], (64,)),
        "conv2_w": n(ks[6], (128, 64, 1, 4)), "conv2_b": n(ks[7], (128,)),
        "bn2_g": u(ks[8], (128,)), "bn2_b": n(ks[9], (128,)),
        "bn2_m": n(ks[10], (128,)), "bn2_v": u(ks[11], (128,)),
        "fc_w": n(ks[12], (256, flat_dim + n_design_scalars + num_conds)),
        "fc_b": n(ks[13], (256,)),
        "bnf_g": u(ks[14], (256,)), "bnf_b": n(ks[15], (256,)),
        "bnf_m": n(ks[16], (256,)), "bnf_v": u(ks[17], (256,)),
        "d_w": n(ks[18], (1, 256)), "d_b": n(ks[19], (1,)),
        "qfc_w": n(ks[20], (128, 256)), "qfc_b": n(ks[21], (128,)),
        "bnq_g": u(ks[22], (128,)), "bnq_b": n(ks[23], (128,)),
        "bnq_m": n(ks[24], (128,)), "bnq_v": u(ks[25], (128,)),
        "qm_w": n(ks[26], (latent_dim, 128)), "qm_b": n(ks[27], (latent_dim,)),
        "ql_w": n(ks[28], (latent_dim, 128)), "ql_b": n(ks[29], (latent_dim,)),
        # Normalizer min/max (deterministic)
        "conds_min": jnp.zeros((num_conds,), jnp.float32),
        "conds_max": jnp.full((num_conds,), 2.0, jnp.float32),
        "ds_min": jnp.full((n_design_scalars,), -1.0, jnp.float32),
        "ds_max": jnp.ones((n_design_scalars,), jnp.float32),
    }


def _bn_scale_bias(gamma, beta, mean, var, pre_bias):
    s = gamma / jnp.sqrt(var + BN_EPS)
    return s, s * (pre_bias - mean) + beta


# ---------------------------------------------------------------------------
# One-time fold: convs -> dense matmuls, BN / Normalizer / layout -> weights
# ---------------------------------------------------------------------------
def prepare_kernel_params(p, design_shape, dtype=jnp.bfloat16):
    H, W = design_shape
    W1 = (W + 2 - 4) // 2 + 1
    W2 = (W1 + 2 - 4) // 2 + 1
    C1, C2 = 64, 128

    # conv1 -> dense (H*W, W1*C1), BN1 scale folded into columns.
    s1, b1c = _bn_scale_bias(p["bn1_g"], p["bn1_b"], p["bn1_m"], p["bn1_v"],
                             p["conv1_b"])
    wk1 = p["conv1_w"][:, 0, :, :] * s1[:, None, None]          # (C1, 2, 4)
    w1d = jnp.zeros((H * W, W1 * C1), jnp.float32)
    for w1 in range(W1):
        for kh in range(H):                  # conv1 kernel height == H
            for kw in range(4):
                wi = 2 * w1 - 1 + kw         # stride 2, pad 1
                if 0 <= wi < W:
                    w1d = w1d.at[kh * W + wi,
                                 w1 * C1:(w1 + 1) * C1].set(wk1[:, kh, kw])
    b1d = jnp.tile(b1c, (W1,))[None, :]

    # conv2 -> dense (W1*C1, W2*C2), BN2 scale folded.
    s2, b2c = _bn_scale_bias(p["bn2_g"], p["bn2_b"], p["bn2_m"], p["bn2_v"],
                             p["conv2_b"])
    w2d = jnp.zeros((W1 * C1, W2 * C2), jnp.float32)
    for w2 in range(W2):
        for kw in range(4):
            wi = 2 * w2 - 1 + kw
            if 0 <= wi < W1:
                blk = (p["conv2_w"][:, :, 0, kw] * s2[:, None]).T  # (C1, C2)
                w2d = w2d.at[wi * C1:(wi + 1) * C1,
                             w2 * C2:(w2 + 1) * C2].set(blk)
    b2d = jnp.tile(b2c, (W2,))[None, :]

    # post_conv_fc: fold BNf, the Normalizers and the NCHW flatten permutation.
    flat_dim = C2 * W2
    sf = p["bnf_g"] / jnp.sqrt(p["bnf_v"] + BN_EPS)
    fc_wT = p["fc_w"].T                                          # (flat+e, 256)
    k = jnp.arange(flat_dim)
    perm = (k % C2) * W2 + (k // C2)   # kernel col (w2*C2+c) -> torch (c*W2+w2)
    wf = fc_wT[:flat_dim][perm] * sf[None, :]

    mins = jnp.concatenate([p["conds_min"], p["ds_min"]])
    maxs = jnp.concatenate([p["conds_max"], p["ds_max"]])
    invs = 1.0 / (maxs - mins + NORM_EPS)
    we_raw = fc_wT[flat_dim:]                                    # (n_extra, 256)
    n_extra = we_raw.shape[0]
    extra_k = _round_up(n_extra, 8)
    wfe = jnp.zeros((extra_k, 256), jnp.float32).at[:n_extra].set(
        invs[:, None] * we_raw * sf[None, :])
    bias_extra = -(mins * invs) @ we_raw                         # (256,)
    bf = (sf * (p["fc_b"] + bias_extra - p["bnf_m"]) + p["bnf_b"])[None, :]

    # fused heads: [q_fc | d_out] and [q_mean | q_logstd]
    sq, bqc = _bn_scale_bias(p["bnq_g"], p["bnq_b"], p["bnq_m"], p["bnq_v"],
                             p["qfc_b"])
    wh = jnp.concatenate([p["qfc_w"].T * sq[None, :], p["d_w"].T], axis=1)
    bh = jnp.concatenate([bqc, p["d_b"]])[None, :]
    wq = jnp.concatenate([p["qm_w"].T, p["ql_w"].T], axis=1)
    bq = jnp.concatenate([p["qm_b"], p["ql_b"]])[None, :]

    return {
        "w1": w1d.astype(dtype), "b1": b1d,
        "w2": w2d.astype(dtype), "b2": b2d,
        "wf": wf.astype(dtype), "wfe": wfe.astype(dtype), "bf": bf,
        "wh": wh.astype(dtype), "bh": bh,
        "wq": wq.astype(dtype), "bq": bq,
    }


# ---------------------------------------------------------------------------
# Forward pass (single pallas_call)
# ---------------------------------------------------------------------------
def discriminator_forward(kp, x, conds, design_scalars, *, row_tile=512):
    B = x.shape[0]
    latent_dim = kp["wq"].shape[1] // 2
    extra_k = kp["wfe"].shape[0]
    n_extra = conds.shape[1] + design_scalars.shape[1]

    # Host-side glue on RAW inputs only (reshape + one concat).
    xf = x.reshape(B, -1).astype(jnp.float32)
    ex = jnp.concatenate(
        [conds.astype(jnp.float32), design_scalars.astype(jnp.float32),
         jnp.zeros((B, extra_k - n_extra), jnp.float32)], axis=1)

    # Batch tiling: one block for small B; parallel row tiles for large B.
    if B <= row_tile:
        tm = _round_up(B, 8)
        bp = tm
    else:
        tm = row_tile                       # multiple of 8
        bp = _round_up(B, tm)
    if bp != B:
        xf = jnp.pad(xf, ((0, bp - B), (0, 0)))
        ex = jnp.pad(ex, ((0, bp - B), (0, 0)))
    grid = (bp // tm,)

    n_out = 1 + 2 * latent_dim

    def row_spec(c):
        return pl.BlockSpec((tm, c), lambda i: (i, 0))

    def fix_spec(a):
        return pl.BlockSpec(a.shape, lambda i: (0, 0))

    out = pl.pallas_call(
        functools.partial(_disc_kernel, latent_dim=latent_dim,
                          q_head_in=kp["wq"].shape[0]),
        out_shape=jax.ShapeDtypeStruct((bp, n_out), jnp.float32),
        grid=grid,
        in_specs=[
            row_spec(xf.shape[1]),
            row_spec(extra_k),
            fix_spec(kp["w1"]), fix_spec(kp["b1"]),
            fix_spec(kp["w2"]), fix_spec(kp["b2"]),
            fix_spec(kp["wf"]), fix_spec(kp["wfe"]), fix_spec(kp["bf"]),
            fix_spec(kp["wh"]), fix_spec(kp["bh"]),
            fix_spec(kp["wq"]), fix_spec(kp["bq"]),
        ],
        out_specs=row_spec(n_out),
        compiler_params=pltpu.CompilerParams(
            dimension_semantics=("parallel",)),
    )(xf, ex,
      kp["w1"], kp["b1"], kp["w2"], kp["b2"],
      kp["wf"], kp["wfe"], kp["bf"],
      kp["wh"], kp["bh"], kp["wq"], kp["bq"])

    out = out[:B]
    d = out[:, :1]
    q = jnp.stack([out[:, 1:1 + latent_dim], out[:, 1 + latent_dim:]], axis=1)
    return d, q


# ---------------------------------------------------------------------------
# Plain-JAX f32 reference (for a correctness cross-check of all the folding)
# ---------------------------------------------------------------------------
def reference_forward(p, x, conds, design_scalars):
    B, H, W = x.shape
    W1 = (W + 2 - 4) // 2 + 1
    W2 = (W1 + 2 - 4) // 2 + 1

    def bn(z, g, b, m, v):
        return g * (z - m) / jnp.sqrt(v + BN_EPS) + b

    def leaky(v):
        return jnp.where(v >= 0.0, v, 0.2 * v)

    xpad = jnp.pad(x, ((0, 0), (0, 0), (1, 1)))
    pat1 = jnp.stack([xpad[:, :, 2 * i:2 * i + 4] for i in range(W1)], axis=1)
    pat1 = pat1.reshape(B * W1, H * 4)
    y1 = pat1 @ p["conv1_w"].reshape(64, -1).T + p["conv1_b"]
    y1 = leaky(bn(y1, p["bn1_g"], p["bn1_b"], p["bn1_m"], p["bn1_v"]))
    y1 = y1.reshape(B, W1, 64)

    y1p = jnp.pad(y1, ((0, 0), (1, 1), (0, 0)))
    pat2 = jnp.stack([y1p[:, 2 * i:2 * i + 4, :] for i in range(W2)], axis=1)
    pat2 = pat2.transpose(0, 1, 3, 2).reshape(B * W2, 64 * 4)
    y2 = pat2 @ p["conv2_w"].reshape(128, -1).T + p["conv2_b"]
    y2 = leaky(bn(y2, p["bn2_g"], p["bn2_b"], p["bn2_m"], p["bn2_v"]))
    flat = y2.reshape(B, W2, 128).transpose(0, 2, 1).reshape(B, -1)

    cn = (conds - p["conds_min"]) / (p["conds_max"] - p["conds_min"] + NORM_EPS)
    dn = (design_scalars - p["ds_min"]) / (p["ds_max"] - p["ds_min"] + NORM_EPS)
    h = jnp.concatenate([flat, cn, dn], axis=1) @ p["fc_w"].T + p["fc_b"]
    h = leaky(bn(h, p["bnf_g"], p["bnf_b"], p["bnf_m"], p["bnf_v"]))

    d = h @ p["d_w"].T + p["d_b"]
    qi = h @ p["qfc_w"].T + p["qfc_b"]
    qi = leaky(bn(qi, p["bnq_g"], p["bnq_b"], p["bnq_m"], p["bnq_v"]))
    qm = qi @ p["qm_w"].T + p["qm_b"]
    ql = jnp.maximum(qi @ p["ql_w"].T + p["ql_b"], -16.0)
    return d, jnp.stack([qm, ql], axis=1)


# ---------------------------------------------------------------------------
if __name__ == "__main__":
    latent_dim, n_design_scalars, num_conds = 3, 1, 2
    design_shape = (2, 16)     # (H, W): conv1 kernel height 2 collapses H
    B = 4

    key = jax.random.PRNGKey(0)
    kprm, kx, kc, ksd = jax.random.split(key, 4)
    raw_params = init_params(kprm, latent_dim, n_design_scalars, num_conds,
                             design_shape)
    kernel_params = prepare_kernel_params(raw_params, design_shape)

    x = jax.random.normal(kx, (B,) + design_shape, jnp.float32)
    conds = jax.random.uniform(kc, (B, num_conds), jnp.float32, 0.0, 2.0)
    dscal = jax.random.uniform(ksd, (B, n_design_scalars), jnp.float32,
                               -1.0, 1.0)

    fwd = jax.jit(discriminator_forward)
    d, q = fwd(kernel_params, x, conds, dscal)
    d = jax.block_until_ready(d)
    q = jax.block_until_ready(q)

    assert d.shape == (B, 1)
    assert q.shape == (B, 2, latent_dim)
    assert bool(jnp.all(jnp.isfinite(d))) and bool(jnp.all(jnp.isfinite(q)))

    # Cross-check the fused/folded bf16 kernel against a plain f32 reference.
    d_ref, q_ref = reference_forward(raw_params, x, conds, dscal)
    assert float(jnp.max(jnp.abs(d - d_ref))) < 0.25
    assert float(jnp.max(jnp.abs(q - q_ref))) < 0.25

    print("KERNEL_OK")
</pallas_src>

<mosaic_0001>
module attributes {stable_mosaic.version = 11 : i64} {
  func.func @_disc_kernel(%arg0: i32, %arg1: memref<8x32xf32, #tpu.memory_space<vmem>>, %arg2: memref<8x8xf32, #tpu.memory_space<vmem>>, %arg3: memref<32x512xbf16, #tpu.memory_space<vmem>>, %arg4: memref<1x512xf32, #tpu.memory_space<vmem>>, %arg5: memref<512x512xbf16, #tpu.memory_space<vmem>>, %arg6: memref<1x512xf32, #tpu.memory_space<vmem>>, %arg7: memref<512x256xbf16, #tpu.memory_space<vmem>>, %arg8: memref<8x256xbf16, #tpu.memory_space<vmem>>, %arg9: memref<1x256xf32, #tpu.memory_space<vmem>>, %arg10: memref<256x129xbf16, #tpu.memory_space<vmem>>, %arg11: memref<1x129xf32, #tpu.memory_space<vmem>>, %arg12: memref<128x6xbf16, #tpu.memory_space<vmem>>, %arg13: memref<1x6xf32, #tpu.memory_space<vmem>>, %arg14: memref<8x7xf32, #tpu.memory_space<vmem>>) attributes {dimension_semantics = [#tpu.dimension_semantics<parallel>], iteration_bounds = array<i64: 1>, scalar_prefetch = 0 : i64, scratch_operands = 0 : i64, tpu.core_type = #tpu.core_type<tc>, window_params = [{transform_indices = @transform_0, window_bounds = array<i64: 8, 32>}, {transform_indices = @transform_1, window_bounds = array<i64: 8, 8>}, {pipeline_mode = #tpu.pipeline_mode<synchronous>, transform_indices = @transform_2, window_bounds = array<i64: 32, 512>}, {pipeline_mode = #tpu.pipeline_mode<synchronous>, transform_indices = @transform_3, window_bounds = array<i64: 1, 512>}, {pipeline_mode = #tpu.pipeline_mode<synchronous>, transform_indices = @transform_4, window_bounds = array<i64: 512, 512>}, {pipeline_mode = #tpu.pipeline_mode<synchronous>, transform_indices = @transform_5, window_bounds = array<i64: 1, 512>}, {pipeline_mode = #tpu.pipeline_mode<synchronous>, transform_indices = @transform_6, window_bounds = array<i64: 512, 256>}, {pipeline_mode = #tpu.pipeline_mode<synchronous>, transform_indices = @transform_7, window_bounds = array<i64: 8, 256>}, {pipeline_mode = #tpu.pipeline_mode<synchronous>, transform_indices = @transform_8, window_bounds = array<i64: 1, 256>}, {pipeline_mode = #tpu.pipeline_mode<synchronous>, transform_indices = @transform_9, window_bounds = array<i64: 256, 129>}, {pipeline_mode = #tpu.pipeline_mode<synchronous>, transform_indices = @transform_10, window_bounds = array<i64: 1, 129>}, {pipeline_mode = #tpu.pipeline_mode<synchronous>, transform_indices = @transform_11, window_bounds = array<i64: 128, 6>}, {pipeline_mode = #tpu.pipeline_mode<synchronous>, transform_indices = @transform_12, window_bounds = array<i64: 1, 6>}, {transform_indices = @transform_13, window_bounds = array<i64: 8, 7>}]} {
    %c0 = arith.constant 0 : index
    %c0_0 = arith.constant 0 : index
    %0 = vector.load %arg1[%c0, %c0_0] : memref<8x32xf32, #tpu.memory_space<vmem>>, vector<8x32xf32>
    %c0_1 = arith.constant 0 : index
    %c0_2 = arith.constant 0 : index
    %1 = vector.load %arg2[%c0_1, %c0_2] : memref<8x8xf32, #tpu.memory_space<vmem>>, vector<8x8xf32>
    %2 = arith.truncf %0 : vector<8x32xf32> to vector<8x32xbf16>
    %c0_3 = arith.constant 0 : index
    %c0_4 = arith.constant 0 : index
    %3 = vector.load %arg3[%c0_3, %c0_4] : memref<32x512xbf16, #tpu.memory_space<vmem>>, vector<32x512xbf16>
    %cst = arith.constant dense<0.000000e+00> : vector<8x512xf32>
    %4 = tpu.matmul %2, %3, %cst {dimension_numbers = #tpu.dot_dimension_numbers<[1], [0], [0], [1], [0, 0, 1, 1], [], []>} : vector<8x32xbf16>, vector<32x512xbf16>, vector<8x512xf32> -> vector<8x512xf32>
    %c0_5 = arith.constant 0 : index
    %c0_6 = arith.constant 0 : index
    %5 = vector.load %arg4[%c0_5, %c0_6] : memref<1x512xf32, #tpu.memory_space<vmem>>, vector<1x512xf32>
    %6 = vector.broadcast %5 : vector<1x512xf32> to vector<8x512xf32>
    %7 = arith.addf %4, %6 : vector<8x512xf32>
    %cst_7 = arith.constant 0.000000e+00 : f32
    %8 = vector.broadcast %cst_7 : f32 to vector<8x512xf32>
    %9 = arith.cmpf oge, %7, %8 : vector<8x512xf32>
    %cst_8 = arith.constant 2.000000e-01 : f32
    %10 = vector.broadcast %cst_8 : f32 to vector<8x512xf32>
    %11 = arith.mulf %10, %7 : vector<8x512xf32>
    %12 = arith.select %9, %7, %11 : vector<8x512xi1>, vector<8x512xf32>
    %13 = arith.truncf %12 : vector<8x512xf32> to vector<8x512xbf16>
    %c0_9 = arith.constant 0 : index
    %c0_10 = arith.constant 0 : index
    %14 = vector.load %arg5[%c0_9, %c0_10] : memref<512x512xbf16, #tpu.memory_space<vmem>>, vector<512x512xbf16>
    %cst_11 = arith.constant dense<0.000000e+00> : vector<8x512xf32>
    %15 = tpu.matmul %13, %14, %cst_11 {dimension_numbers = #tpu.dot_dimension_numbers<[1], [0], [0], [1], [0, 0, 1, 1], [], []>} : vector<8x512xbf16>, vector<512x512xbf16>, vector<8x512xf32> -> vector<8x512xf32>
    %c0_12 = arith.constant 0 : index
    %c0_13 = arith.constant 0 : index
    %16 = vector.load %arg6[%c0_12, %c0_13] : memref<1x512xf32, #tpu.memory_space<vmem>>, vector<1x512xf32>
    %17 = vector.broadcast %16 : vector<1x512xf32> to vector<8x512xf32>
    %18 = arith.addf %15, %17 : vector<8x512xf32>
    %cst_14 = arith.constant 0.000000e+00 : f32
    %19 = vector.broadcast %cst_14 : f32 to vector<8x512xf32>
    %20 = arith.cmpf oge, %18, %19 : vector<8x512xf32>
    %cst_15 = arith.constant 2.000000e-01 : f32
    %21 = vector.broadcast %cst_15 : f32 to vector<8x512xf32>
    %22 = arith.mulf %21, %18 : vector<8x512xf32>
    %23 = arith.select %20, %18, %22 : vector<8x512xi1>, vector<8x512xf32>
    %24 = arith.truncf %23 : vector<8x512xf32> to vector<8x512xbf16>
    %c0_16 = arith.constant 0 : index
    %c0_17 = arith.constant 0 : index
    %25 = vector.load %arg7[%c0_16, %c0_17] : memref<512x256xbf16, #tpu.memory_space<vmem>>, vector<512x256xbf16>
    %cst_18 = arith.constant dense<0.000000e+00> : vector<8x256xf32>
    %26 = tpu.matmul %24, %25, %cst_18 {dimension_numbers = #tpu.dot_dimension_numbers<[1], [0], [0], [1], [0, 0, 1, 1], [], []>} : vector<8x512xbf16>, vector<512x256xbf16>, vector<8x256xf32> -> vector<8x256xf32>
    %27 = arith.truncf %1 : vector<8x8xf32> to vector<8x8xbf16>
    %c0_19 = arith.constant 0 : index
    %c0_20 = arith.constant 0 : index
    %28 = vector.load %arg8[%c0_19, %c0_20] : memref<8x256xbf16, #tpu.memory_space<vmem>>, vector<8x256xbf16>
    %cst_21 = arith.constant dense<0.000000e+00> : vector<8x256xf32>
    %29 = tpu.matmul %27, %28, %cst_21 {dimension_numbers = #tpu.dot_dimension_numbers<[1], [0], [0], [1], [0, 0, 1, 1], [], []>} : vector<8x8xbf16>, vector<8x256xbf16>, vector<8x256xf32> -> vector<8x256xf32>
    %30 = arith.addf %26, %29 : vector<8x256xf32>
    %c0_22 = arith.constant 0 : index
    %c0_23 = arith.constant 0 : index
    %31 = vector.load %arg9[%c0_22, %c0_23] : memref<1x256xf32, #tpu.memory_space<vmem>>, vector<1x256xf32>
    %32 = vector.broadcast %31 : vector<1x256xf32> to vector<8x256xf32>
    %33 = arith.addf %30, %32 : vector<8x256xf32>
    %cst_24 = arith.constant 0.000000e+00 : f32
    %34 = vector.broadcast %cst_24 : f32 to vector<8x256xf32>
    %35 = arith.cmpf oge, %33, %34 : vector<8x256xf32>
    %cst_25 = arith.constant 2.000000e-01 : f32
    %36 = vector.broadcast %cst_25 : f32 to vector<8x256xf32>
    %37 = arith.mulf %36, %33 : vector<8x256xf32>
    %38 = arith.select %35, %33, %37 : vector<8x256xi1>, vector<8x256xf32>
    %39 = arith.truncf %38 : vector<8x256xf32> to vector<8x256xbf16>
    %c0_26 = arith.constant 0 : index
    %c0_27 = arith.constant 0 : index
    %40 = vector.load %arg10[%c0_26, %c0_27] : memref<256x129xbf16, #tpu.memory_space<vmem>>, vector<256x129xbf16>
    %cst_28 = arith.constant dense<0.000000e+00> : vector<8x129xf32>
    %41 = tpu.matmul %39, %40, %cst_28 {dimension_numbers = #tpu.dot_dimension_numbers<[1], [0], [0], [1], [0, 0, 1, 1], [], []>} : vector<8x256xbf16>, vector<256x129xbf16>, vector<8x129xf32> -> vector<8x129xf32>
    %c0_29 = arith.constant 0 : index
    %c0_30 = arith.constant 0 : index
    %42 = vector.load %arg11[%c0_29, %c0_30] : memref<1x129xf32, #tpu.memory_space<vmem>>, vector<1x129xf32>
    %43 = vector.broadcast %42 : vector<1x129xf32> to vector<8x129xf32>
    %44 = arith.addf %41, %43 : vector<8x129xf32>
    %45 = vector.extract_strided_slice %44 {offsets = [0, 0], sizes = [8, 128], strides = [1, 1]} : vector<8x129xf32> to vector<8x128xf32>
    %cst_31 = arith.constant 0.000000e+00 : f32
    %46 = vector.broadcast %cst_31 : f32 to vector<8x128xf32>
    %47 = arith.cmpf oge, %45, %46 : vector<8x128xf32>
    %cst_32 = arith.constant 2.000000e-01 : f32
    %48 = vector.broadcast %cst_32 : f32 to vector<8x128xf32>
    %49 = arith.mulf %48, %45 : vector<8x128xf32>
    %50 = arith.select %47, %45, %49 : vector<8x128xi1>, vector<8x128xf32>
    %51 = vector.extract_strided_slice %44 {offsets = [0, 128], sizes = [8, 1], strides = [1, 1]} : vector<8x129xf32> to vector<8x1xf32>
    %52 = arith.truncf %50 : vector<8x128xf32> to vector<8x128xbf16>
    %c0_33 = arith.constant 0 : index
    %c0_34 = arith.constant 0 : index
    %53 = vector.load %arg12[%c0_33, %c0_34] : memref<128x6xbf16, #tpu.memory_space<vmem>>, vector<128x6xbf16>
    %cst_35 = arith.constant dense<0.000000e+00> : vector<8x6xf32>
    %54 = tpu.matmul %52, %53, %cst_35 {dimension_numbers = #tpu.dot_dimension_numbers<[1], [0], [0], [1], [0, 0, 1, 1], [], []>} : vector<8x128xbf16>, vector<128x6xbf16>, vector<8x6xf32> -> vector<8x6xf32>
    %c0_36 = arith.constant 0 : index
    %c0_37 = arith.constant 0 : index
    %55 = vector.load %arg13[%c0_36, %c0_37] : memref<1x6xf32, #tpu.memory_space<vmem>>, vector<1x6xf32>
    %56 = vector.broadcast %55 : vector<1x6xf32> to vector<8x6xf32>
    %57 = arith.addf %54, %56 : vector<8x6xf32>
    %58 = tpu.iota {dimensions = array<i32: 1>} : vector<8x6xi32>
    %c3_i32 = arith.constant 3 : i32
    %59 = vector.broadcast %c3_i32 : i32 to vector<8x6xi32>
    %60 = arith.cmpi sge, %58, %59 : vector<8x6xi32>
    %cst_38 = arith.constant -1.600000e+01 : f32
    %61 = vector.broadcast %cst_38 : f32 to vector<8x6xf32>
    %62 = arith.maximumf %57, %61 : vector<8x6xf32>
    %63 = arith.select %60, %62, %57 : vector<8x6xi1>, vector<8x6xf32>
    %c0_39 = arith.constant 0 : index
    %c0_40 = arith.constant 0 : index
    %64 = vector.load %arg14[%c0_39, %c0_40] : memref<8x7xf32, #tpu.memory_space<vmem>>, vector<8x1xf32>
    tpu.vector_store %arg14[%c0_39, %c0_40], %51 {strides = array<i32>} : memref<8x7xf32, #tpu.memory_space<vmem>>, vector<8x1xf32>,
    %c0_41 = arith.constant 0 : index
    %c1 = arith.constant 1 : index
    %65 = vector.load %arg14[%c0_41, %c1] : memref<8x7xf32, #tpu.memory_space<vmem>>, vector<8x6xf32>
    tpu.vector_store %arg14[%c0_41, %c1], %63 {strides = array<i32>} : memref<8x7xf32, #tpu.memory_space<vmem>>, vector<8x6xf32>,
    return
  }
  func.func @transform_0(%arg0: i32) -> (i32, i32) {
    %c0_i32 = arith.constant 0 : i32
    %c0_i32_0 = arith.constant 0 : i32
    return %arg0, %c0_i32 : i32, i32
  }
  func.func @transform_1(%arg0: i32) -> (i32, i32) {
    %c0_i32 = arith.constant 0 : i32
    %c0_i32_0 = arith.constant 0 : i32
    return %arg0, %c0_i32 : i32, i32
  }
  func.func @transform_2(%arg0: i32) -> (i32, i32) {
    %c0_i32 = arith.constant 0 : i32
    %c0_i32_0 = arith.constant 0 : i32
    %c0_i32_1 = arith.constant 0 : i32
    return %c0_i32, %c0_i32_0 : i32, i32
  }
  func.func @transform_3(%arg0: i32) -> (i32, i32) {
    %c0_i32 = arith.constant 0 : i32
    %c0_i32_0 = arith.constant 0 : i32
    %c0_i32_1 = arith.constant 0 : i32
    return %c0_i32, %c0_i32_0 : i32, i32
  }
  func.func @transform_4(%arg0: i32) -> (i32, i32) {
    %c0_i32 = arith.constant 0 : i32
    %c0_i32_0 = arith.constant 0 : i32
    %c0_i32_1 = arith.constant 0 : i32
    return %c0_i32, %c0_i32_0 : i32, i32
  }
  func.func @transform_5(%arg0: i32) -> (i32, i32) {
    %c0_i32 = arith.constant 0 : i32
    %c0_i32_0 = arith.constant 0 : i32
    %c0_i32_1 = arith.constant 0 : i32
    return %c0_i32, %c0_i32_0 : i32, i32
  }
  func.func @transform_6(%arg0: i32) -> (i32, i32) {
    %c0_i32 = arith.constant 0 : i32
    %c0_i32_0 = arith.constant 0 : i32
    %c0_i32_1 = arith.constant 0 : i32
    return %c0_i32, %c0_i32_0 : i32, i32
  }
  func.func @transform_7(%arg0: i32) -> (i32, i32) {
    %c0_i32 = arith.constant 0 : i32
    %c0_i32_0 = arith.constant 0 : i32
    %c0_i32_1 = arith.constant 0 : i32
    return %c0_i32, %c0_i32_0 : i32, i32
  }
  func.func @transform_8(%arg0: i32) -> (i32, i32) {
    %c0_i32 = arith.constant 0 : i32
    %c0_i32_0 = arith.constant 0 : i32
    %c0_i32_1 = arith.constant 0 : i32
    return %c0_i32, %c0_i32_0 : i32, i32
  }
  func.func @transform_9(%arg0: i32) -> (i32, i32) {
    %c0_i32 = arith.constant 0 : i32
    %c0_i32_0 = arith.constant 0 : i32
    %c0_i32_1 = arith.constant 0 : i32
    return %c0_i32, %c0_i32_0 : i32, i32
  }
  func.func @transform_10(%arg0: i32) -> (i32, i32) {
    %c0_i32 = arith.constant 0 : i32
    %c0_i32_0 = arith.constant 0 : i32
    %c0_i32_1 = arith.constant 0 : i32
    return %c0_i32, %c0_i32_0 : i32, i32
  }
  func.func @transform_11(%arg0: i32) -> (i32, i32) {
    %c0_i32 = arith.constant 0 : i32
    %c0_i32_0 = arith.constant 0 : i32
    %c0_i32_1 = arith.constant 0 : i32
    return %c0_i32, %c0_i32_0 : i32, i32
  }
  func.func @transform_12(%arg0: i32) -> (i32, i32) {
    %c0_i32 = arith.constant 0 : i32
    %c0_i32_0 = arith.constant 0 : i32
    %c0_i32_1 = arith.constant 0 : i32
    return %c0_i32, %c0_i32_0 : i32, i32
  }
  func.func @transform_13(%arg0: i32) -> (i32, i32) {
    %c0_i32 = arith.constant 0 : i32
    %c0_i32_0 = arith.constant 0 : i32
    return %arg0, %c0_i32 : i32, i32
  }
}

</mosaic_0001>

<bundles_post_ra>
// kernel: discriminator_forward.1
= control target key start
LH: loop header
LB: loop body
LE: loop exit
PB: predicated region body
PF: predicated region fallthrough
CT: control target
= control target key end

     0   :  { %18 = vsyncpa [#allocation3], 0  ;;  %s3338_s0 = inlined_call_operand.vmem [shape: f32[8,32], index: 0, kind: input, shape index: {}]   ;;  %s3339_s1 = inlined_call_operand.vmem [shape: f32[8,8], index: 1, kind: input, shape index: {}]   ;;  %s3340_s2 = inlined_call_operand.hbm [shape: bf16[32,512], index: 2, kind: input, shape index: {}]   ;;  %s3341_s3 = inlined_call_operand.vmem [shape: f32[1,512], index: 3, kind: input, shape index: {}]   ;;  %s3342_s4 = inlined_call_operand.hbm [shape: bf16[512,512], index: 4, kind: input, shape index: {}]   ;;  %s3343_s5 = inlined_call_operand.vmem [shape: f32[1,512], index: 5, kind: input, shape index: {}]   ;;  %s3344_s6 = inlined_call_operand.vmem [shape: bf16[512,256], index: 6, kind: input, shape index: {}]   ;;  %s3345_s7 = inlined_call_operand.vmem [shape: bf16[8,256], index: 7, kind: input, shape index: {}]   ;;  %s3346_s8 = inlined_call_operand.vmem [shape: f32[1,256], index: 8, kind: input, shape index: {}]   ;;  %s3347_s9 = inlined_call_operand.vmem [shape: bf16[256,129], index: 9, kind: input, shape index: {}]   ;;  %s3348_s10 = inlined_call_operand.vmem [shape: f32[1,129], index: 10, kind: input, shape index: {}]   ;;  %s3349_s11 = inlined_call_operand.vmem [shape: bf16[128,6], index: 11, kind: input, shape index: {}]   ;;  %s3350_s12 = inlined_call_operand.vmem [shape: f32[1,6], index: 12, kind: input, shape index: {}]   ;;  %s3351_s13 = inlined_call_operand.vmem [shape: f32[8,7], index: 13, kind: output, shape index: {}]  }
   0x1   :  { %19 = vsyncpa [#allocation5], 0  ;;  %s2846_s25 = smov [#allocation2]   ;;  %s2798_s29 = scalar_lea.hbm %s3340_s2, 1024 }
   0x2   :  { %s29_s26 = sshll.u32 %s2846_s25, 4  ;;  %p2799_p0 = scmp.ne.s32.totalorder %s3340_s2, %s2798_s29  ;;  %s30_s26 = int_to_ptr.vmem [resolvable:$true] %s29_s26 }
   0x3   :  { %p2802_p1 = scmp.lt.u32.totalorder %s2798_s29, %s3340_s2 }
   0x5   :  { %p2804_p2 = pnand %p2802_p1, %p2799_p0 }
   0x7   :  { %2807 = shalt.err (!%p2804_p2)
}
   0x8   :  { %s2808_s17 = scalar_lea.vmem %s30_s26, 1024  ;;  %p2813_p4 = scmp.lt.s32.totalorder %s30_s26, %s30_s26 }
   0x9   :  { %p2809_p3 = scmp.ne.s32.totalorder %s30_s26, %s2808_s17  ;;  %p2814_p5 = scmp.lt.s32.totalorder %s2808_s17, %s2808_s17 }
   0xb   :  { %p2815_p6 = por %p2814_p5, %p2813_p4 }
   0xd   :  { %p2816_p7 = pnand %p2815_p6, %p2809_p3 }
   0xf   :  { %2819 = shalt.err (!%p2816_p7)
}
  0x10   :  { %s2847_s18 = smov 256   ;;  %s2848_s19 = smov 16  }
  0x11   :  { %35 = dma.hbm_to_vmem [thread:$0]  %s3340_s2, 1024, %s30_s26, [#allocation3], %s2847_s18, %s2847_s18, %s2848_s19  }
  0x12   :  { %s2849_s22 = smov [#allocation4]   ;;  %s2820_s27 = scalar_lea.hbm %s3342_s4, 16384 }
  0x13   :  { %s43_s23 = sshll.u32 %s2849_s22, 4  ;;  %p2821_p8 = scmp.ne.s32.totalorder %s3342_s4, %s2820_s27  ;;  %s44_s23 = int_to_ptr.vmem [resolvable:$true] %s43_s23 }
  0x14   :  { %p2824_p9 = scmp.lt.u32.totalorder %s2820_s27, %s3342_s4 }
  0x16   :  { %p2826_p10 = pnand %p2824_p9, %p2821_p8 }
  0x18   :  { %2829 = shalt.err (!%p2826_p10)
}
  0x19   :  { %s2830_s15 = scalar_lea.vmem %s44_s23, 16384  ;;  %p2835_p12 = scmp.lt.s32.totalorder %s44_s23, %s44_s23 }
  0x1a   :  { %p2831_p11 = scmp.ne.s32.totalorder %s44_s23, %s2830_s15  ;;  %p2836_p13 = scmp.lt.s32.totalorder %s2830_s15, %s2830_s15 }
  0x1c   :  { %p2837_p0 = por %p2836_p13, %p2835_p12 }
  0x1e   :  { %p2838_p1 = pnand %p2837_p0, %p2831_p11 }
  0x20   :  { %2841 = shalt.err (!%p2838_p1)
}
  0x21   :  { %49 = dma.hbm_to_vmem [thread:$0]  %s3342_s4, 16384, %s44_s23, [#allocation5], %s2847_s18, %s2847_s18, %s2848_s19  }
  0x22   :  { %2842 = dma.done.wait [#allocation3], 1024  }
  0x23   :  { %2843 = vsyncadd [#allocation3], 4294966272 }
  0x24   :  { %2844 = dma.done.wait [#allocation5], 16384  }
  0x25   :  { %2845 = vsyncadd [#allocation5], 4294950912  ;;  %v2850_v0 = vmov 0   ;;  %v2440_v1 = vld [vmem:[#allocation2 + $0x4] ss:$16 sps:$4 sm:$0xff]   ;;  %vm146_vm0 = vcmask 261120  }
  0x26   :  { %182 = vmatprep.mubr.bf16.mxu0 %v2850_v0  ;;  %v2442_v2 = vld [vmem:[#allocation2] ss:$16 sps:$4 sm:$0xff]   ;;  %150 = vmatprep.subr.bf16.mxu0 %v2440_v1  ;;  %v2443_v3 = vld [vmem:[#allocation2 + $0x24] ss:$16 sps:$4 sm:$0xff]   ;;  %v2448_v6 = vld [vmem:[#allocation2 + $0xc] ss:$16 sps:$4 sm:$0xff]  }
  0x27   :  { %v2445_v4 = vld [vmem:[#allocation2 + $0x20] ss:$16 sps:$4 sm:$0xff]   ;;  %151 = vmatpush1.bf16.msra.mxu0 %v2442_v2  ;;  %v2446_v8 = vld [vmem:[#allocation2 + $0x8] ss:$16 sps:$4 sm:$0xff]   ;;  %v2451_v9 = vld [vmem:[#allocation2 + $0x2c] ss:$16 sps:$4 sm:$0xff]  }
  0x28   :  { %v73_v5 = vld [vmem:[%s3338_s0] sm:$0xff]  ;;  %152 = vmatprep.subr.bf16.mxu0 %v2443_v3  ;;  %v2455_v10 = vld [vmem:[#allocation4 + $0xc] ss:$16 sps:$4 sm:$0xff]   ;;  %v2457_v11 = vld [vmem:[#allocation4 + $0x8] ss:$16 sps:$4 sm:$0xff]   ;;  %vm1293_vm5 = vcmask 1043456  }
  0x29   :  { %v75_v7 = vpack.c.bf16 %v73_v5, %v73_v5  ;;  %1120 = vmatprep.subr.bf16.mxu1 %v2455_v10  ;;  %v2461_v12 = vld [vmem:[#allocation4 + $0x2c] ss:$16 sps:$4 sm:$0xff]   ;;  %v2463_v13 = vld [vmem:[#allocation4 + $0x28] ss:$16 sps:$4 sm:$0xff]   ;;  %v2454_v15 = vld [vmem:[#allocation4 + $0x4] ss:$16 sps:$4 sm:$0xff]  }
  0x2a   :  { %1121 = vmatpush1.bf16.msra.mxu1 %v2457_v11  ;;  %v2449_v14 = vld [vmem:[#allocation2 + $0x28] ss:$16 sps:$4 sm:$0xff]   ;;  %v2467_v16 = vld [vmem:[#allocation4 + $0x4c] ss:$16 sps:$4 sm:$0xff]   ;;  %v2452_v17 = vld [vmem:[#allocation4] ss:$16 sps:$4 sm:$0xff]  }
  0x2b   :  { %153 = vmatpush1.bf16.msra.mxu0 %v2445_v4  ;;  %1122 = vmatprep.subr.bf16.mxu1 %v2461_v12  ;;  %v2469_v18 = vld [vmem:[#allocation4 + $0x48] ss:$16 sps:$4 sm:$0xff]   ;;  %v2473_v19 = vld [vmem:[#allocation4 + $0x6c] ss:$16 sps:$4 sm:$0xff]   ;;  %v2460_v20 = vld [vmem:[#allocation4 + $0x24] ss:$16 sps:$4 sm:$0xff]  }
  0x2c   :  { %191 = vmatprep.subr.bf16.mxu0 %v2448_v6  ;;  %v2458_v21 = vld [vmem:[#allocation4 + $0x20] ss:$16 sps:$4 sm:$0xff]   ;;  %v2475_v22 = vld [vmem:[#allocation4 + $0x68] ss:$16 sps:$4 sm:$0xff]   ;;  %v2479_v23 = vld [vmem:[#allocation4 + $0x8c] ss:$16 sps:$4 sm:$0xff]  }
  0x2d   :  { %v2466_v24 = vld [vmem:[#allocation4 + $0x44] ss:$16 sps:$4 sm:$0xff]   ;;  %v2464_v25 = vld [vmem:[#allocation4 + $0x40] ss:$16 sps:$4 sm:$0xff]   ;;  %v2481_v26 = vld [vmem:[#allocation4 + $0x88] ss:$16 sps:$4 sm:$0xff]  }
  0x2e   :  { %2152 = vmatmul.mubr.msk.bf16.vlgmr.msra.gmra.mrb[0].mxu0 %vm146_vm0, %v75_v7  ;;  %1123 = vmatpush1.bf16.msra.mxu1 %v2463_v13  ;;  %v2485_v27 = vld [vmem:[#allocation4 + $0xac] ss:$16 sps:$4 sm:$0xff]   ;;  %v2472_v28 = vld [vmem:[#allocation4 + $0x64] ss:$16 sps:$4 sm:$0xff]   ;;  %v2470_v29 = vld [vmem:[#allocation4 + $0x60] ss:$16 sps:$4 sm:$0xff]  }
  0x2f   :  { %192 = vmatpush1.bf16.msra.mxu0 %v2446_v8  ;;  %223 = vmatprep.mubr.bf16.mxu0 %v2850_v0  ;;  %v2487_v30 = vld [vmem:[#allocation4 + $0xa8] ss:$16 sps:$4 sm:$0xff]   ;;  %v2491_v31 = vld [vmem:[#allocation4 + $0xcc] ss:$16 sps:$4 sm:$0xff]   ;;  %v2478_v32 = vld [vmem:[#allocation4 + $0x84] ss:$16 sps:$4 sm:$0xff]  }
  0x30   :  { %193 = vmatprep.subr.bf16.mxu0 %v2451_v9  ;;  %1124 = vmatprep.subr.bf16.mxu1 %v2467_v16  ;;  %v2476_v33 = vld [vmem:[#allocation4 + $0x80] ss:$16 sps:$4 sm:$0xff]   ;;  %v2493_v34 = vld [vmem:[#allocation4 + $0xc8] ss:$16 sps:$4 sm:$0xff]   ;;  %v2497_v35 = vld [vmem:[#allocation4 + $0xec] ss:$16 sps:$4 sm:$0xff]  }
  0x31   :  { %v2484_v36 = vld [vmem:[#allocation4 + $0xa4] ss:$16 sps:$4 sm:$0xff]   ;;  %v2482_v37 = vld [vmem:[#allocation4 + $0xa0] ss:$16 sps:$4 sm:$0xff]   ;;  %v2499_v38 = vld [vmem:[#allocation4 + $0xe8] ss:$16 sps:$4 sm:$0xff]  }
  0x32   :  { %1125 = vmatpush1.bf16.msra.mxu1 %v2469_v18  ;;  %v2503_v39 = vld [vmem:[#allocation4 + $0x10c] ss:$16 sps:$4 sm:$0xff]   ;;  %v2490_v40 = vld [vmem:[#allocation4 + $0xc4] ss:$16 sps:$4 sm:$0xff]   ;;  %v2488_v41 = vld [vmem:[#allocation4 + $0xc0] ss:$16 sps:$4 sm:$0xff]  }
  0x33   :  { %194 = vmatpush1.bf16.msra.mxu0 %v2449_v14  ;;  %1126 = vmatprep.subr.bf16.mxu1 %v2473_v19  ;;  %v2505_v42 = vld [vmem:[#allocation4 + $0x108] ss:$16 sps:$4 sm:$0xff]   ;;  %v2509_v43 = vld [vmem:[#allocation4 + $0x12c] ss:$16 sps:$4 sm:$0xff]   ;;  %v2496_v44 = vld [vmem:[#allocation4 + $0xe4] ss:$16 sps:$4 sm:$0xff]   ;;  %v86_v14 = vlaneseq }
  0x34   :  { %1038 = vmatprep.subr.bf16.mxu0 %v2454_v15  ;;  %v2494_v45 = vld [vmem:[#allocation4 + $0xe0] ss:$16 sps:$4 sm:$0xff]   ;;  %v2502_v46 = vld [vmem:[#allocation4 + $0x104] ss:$16 sps:$4 sm:$0xff]   ;;  %v2511_v47 = vld [vmem:[#allocation4 + $0x128] ss:$16 sps:$4 sm:$0xff]  }
  0x35   :  { %v2515_v48 = vld [vmem:[#allocation4 + $0x14c] ss:$16 sps:$4 sm:$0xff]   ;;  %v2517_v49 = vld [vmem:[#allocation4 + $0x148] ss:$16 sps:$4 sm:$0xff]   ;;  %v2500_v50 = vld [vmem:[#allocation4 + $0x100] ss:$16 sps:$4 sm:$0xff]  }
  0x36   :  { %2153 = vmatmul.mubr.msk.bf16.vlgmr.msra.gmra.mrb[4].mxu0 %vm146_vm0, %v75_v7  ;;  %1127 = vmatpush1.bf16.msra.mxu1 %v2475_v22  ;;  %v2521_v51 = vld [vmem:[#allocation4 + $0x16c] ss:$16 sps:$4 sm:$0xff]   ;;  %v2508_v52 = vld [vmem:[#allocation4 + $0x124] ss:$16 sps:$4 sm:$0xff]   ;;  %v2523_v53 = vld [vmem:[#allocation4 + $0x168] ss:$16 sps:$4 sm:$0xff]  }
  0x37   :  { %1039 = vmatpush1.bf16.msra.mxu0 %v2452_v17  ;;  %1128 = vmatprep.subr.bf16.mxu1 %v2479_v23  ;;  %v2506_v54 = vld [vmem:[#allocation4 + $0x120] ss:$16 sps:$4 sm:$0xff]   ;;  %v2527_v55 = vld [vmem:[#allocation4 + $0x18c] ss:$16 sps:$4 sm:$0xff]   ;;  %v2514_v56 = vld [vmem:[#allocation4 + $0x144] ss:$16 sps:$4 sm:$0xff]  }
  0x38   :  { %1040 = vmatprep.subr.bf16.mxu0 %v2460_v20  ;;  %v2529_v57 = vld [vmem:[#allocation4 + $0x188] ss:$16 sps:$4 sm:$0xff]   ;;  %v2512_v58 = vld [vmem:[#allocation4 + $0x140] ss:$16 sps:$4 sm:$0xff]   ;;  %v2533_v59 = vld [vmem:[#allocation4 + $0x1ac] ss:$16 sps:$4 sm:$0xff]  }
  0x39   :  { %v2520_v60 = vld [vmem:[#allocation4 + $0x164] ss:$16 sps:$4 sm:$0xff]   ;;  %v2535_v61 = vld [vmem:[#allocation4 + $0x1a8] ss:$16 sps:$4 sm:$0xff]   ;;  %v2518_v62 = vld [vmem:[#allocation4 + $0x160] ss:$16 sps:$4 sm:$0xff]  }
  0x3a   :  { %1129 = vmatpush1.bf16.msra.mxu1 %v2481_v26  ;;  %v2526_v63 = vld [vmem:[#allocation4 + $0x184] ss:$16 sps:$4 sm:$0xff]   ;;  %v2524_v1 = vld [vmem:[#allocation4 + $0x180] ss:$16 sps:$4 sm:$0xff]   ;;  %v2539_v5 = vld [vmem:[#allocation4 + $0x1cc] ss:$16 sps:$4 sm:$0xff]  }
  0x3b   :  { %1041 = vmatpush1.bf16.msra.mxu0 %v2458_v21  ;;  %1130 = vmatprep.subr.bf16.mxu1 %v2485_v27  ;;  %v2532_v2 = vld [vmem:[#allocation4 + $0x1a4] ss:$16 sps:$4 sm:$0xff]   ;;  %v2530_v3 = vld [vmem:[#allocation4 + $0x1a0] ss:$16 sps:$4 sm:$0xff]   ;;  %v2541_v7 = vld [vmem:[#allocation4 + $0x1c8] ss:$16 sps:$4 sm:$0xff]  }
  0x3c   :  { %1042 = vmatprep.subr.bf16.mxu0 %v2466_v24  ;;  %v2538_v4 = vld [vmem:[#allocation4 + $0x1c4] ss:$16 sps:$4 sm:$0xff]   ;;  %v2536_v6 = vld [vmem:[#allocation4 + $0x1c0] ss:$16 sps:$4 sm:$0xff]   ;;  %v2545_v9 = vld [vmem:[#allocation4 + $0x1ec] ss:$16 sps:$4 sm:$0xff]  }
  0x3d   :  { %v2544_v8 = vld [vmem:[#allocation4 + $0x1e4] ss:$16 sps:$4 sm:$0xff]   ;;  %v2542_v10 = vld [vmem:[#allocation4 + $0x1e0] ss:$16 sps:$4 sm:$0xff]   ;;  %v2547_v11 = vld [vmem:[#allocation4 + $0x1e8] ss:$16 sps:$4 sm:$0xff]  }
  0x3e   :  { %1131 = vmatpush1.bf16.msra.mxu1 %v2487_v30  ;;  %v2550_v12 = vld [vmem:[#allocation4 + $0x204] ss:$16 sps:$4 sm:$0xff]   ;;  %v2553_v13 = vld [vmem:[#allocation4 + $0x20c] ss:$16 sps:$4 sm:$0xff]   ;;  %v2956_v15 = vshrl.u32 %v86_v14, 7  ;;  %vm1289_vm6 = vcmask 64512  }
  0x3f   :  { %1043 = vmatpush1.bf16.msra.mxu0 %v2464_v25  ;;  %1132 = vmatprep.subr.bf16.mxu1 %v2491_v31  ;;  %v2964_v17 = vld [vmem:[%s3341_s3] sm:$0xf]  ;;  %vm2852_vm13 = vmmov 0   ;;  %vm2130_vm14 = vcmask 7168   ;;  %s2853_s20 = smov 1  }
  0x40   :  { %1044 = vmatprep.subr.bf16.mxu0 %v2472_v28  ;;  %v2959_v16 = vsub.s32 0, %v2956_v15  ;;  %v2967_v18 = vsub.s32 1, %v2956_v15  ;;  %v100_v26 = vsub.s32 3, %v2956_v15 }
  0x42   :  { %1133 = vmatpush1.bf16.msra.mxu1 %v2493_v34  ;;  %v89_v19 = vrot.slane %v2964_v17, %v2959_v16  ;;  %v93_v20 = vrot.slane %v2964_v17, %v2967_v18  ;;  %v2548_v34 = vld [vmem:[#allocation4 + $0x200] ss:$16 sps:$4 sm:$0xff]  }
  0x43   :  { %1045 = vmatpush1.bf16.msra.mxu0 %v2470_v29  ;;  %1134 = vmatprep.subr.bf16.mxu1 %v2497_v35  ;;  %v2551_v35 = vld [vmem:[#allocation4 + $0x208] ss:$16 sps:$4 sm:$0xff]  }
  0x44   :  { %1046 = vmatprep.subr.bf16.mxu0 %v2478_v32  ;;  %v101_v32 = vrot.slane %v2964_v17, %v100_v26 }
  0x46   :  { %1135 = vmatpush1.bf16.msra.mxu1 %v2499_v38  ;;  %v2559_v38 = vld [vmem:[#allocation4 + $0x22c] ss:$16 sps:$4 sm:$0xff]  }
  0x47   :  { %1047 = vmatpush1.bf16.msra.mxu0 %v2476_v33  ;;  %1136 = vmatprep.subr.bf16.mxu1 %v2503_v39 }
  0x48   :  { %1048 = vmatprep.subr.bf16.mxu0 %v2484_v36 }
  0x4a   :  { %1137 = vmatpush1.bf16.msra.mxu1 %v2505_v42 }
  0x4b   :  { %1049 = vmatpush1.bf16.msra.mxu0 %v2482_v37  ;;  %1138 = vmatprep.subr.bf16.mxu1 %v2509_v43  ;;  %v2556_v37 = vld [vmem:[#allocation4 + $0x224] ss:$16 sps:$4 sm:$0xff]  }
  0x4c   :  { %1050 = vmatprep.subr.bf16.mxu0 %v2490_v40 }
  0x4e   :  { %1139 = vmatpush1.bf16.msra.mxu1 %v2511_v47  ;;  %v2565_v47 = vld [vmem:[#allocation4 + $0x24c] ss:$16 sps:$4 sm:$0xff]  }
  0x4f   :  { %1051 = vmatpush1.bf16.msra.mxu0 %v2488_v41  ;;  %1140 = vmatprep.subr.bf16.mxu1 %v2515_v48  ;;  %v2554_v41 = vld [vmem:[#allocation4 + $0x220] ss:$16 sps:$4 sm:$0xff]  }
  0x50   :  { %1052 = vmatprep.subr.bf16.mxu0 %v2496_v44  ;;  %v2557_v44 = vld [vmem:[#allocation4 + $0x228] ss:$16 sps:$4 sm:$0xff]  }
  0x52   :  { %1141 = vmatpush1.bf16.msra.mxu1 %v2517_v49 }
  0x53   :  { %1053 = vmatpush1.bf16.msra.mxu0 %v2494_v45  ;;  %1142 = vmatprep.subr.bf16.mxu1 %v2521_v51  ;;  %v2562_v45 = vld [vmem:[#allocation4 + $0x244] ss:$16 sps:$4 sm:$0xff]   ;;  %v2563_v51 = vld [vmem:[#allocation4 + $0x248] ss:$16 sps:$4 sm:$0xff]  }
  0x54   :  { %1054 = vmatprep.subr.bf16.mxu0 %v2502_v46 }
  0x56   :  { %1143 = vmatpush1.bf16.msra.mxu1 %v2523_v53  ;;  %v2568_v53 = vld [vmem:[#allocation4 + $0x264] ss:$16 sps:$4 sm:$0xff]  }
  0x57   :  { %1055 = vmatpush1.bf16.msra.mxu0 %v2500_v50  ;;  %1144 = vmatprep.subr.bf16.mxu1 %v2527_v55  ;;  %v2560_v50 = vld [vmem:[#allocation4 + $0x240] ss:$16 sps:$4 sm:$0xff]  }
  0x58   :  { %1056 = vmatprep.subr.bf16.mxu0 %v2508_v52  ;;  %v2566_v55 = vld [vmem:[#allocation4 + $0x260] ss:$16 sps:$4 sm:$0xff]  }
  0x5a   :  { %1145 = vmatpush1.bf16.msra.mxu1 %v2529_v57  ;;  %v2574_v57 = vld [vmem:[#allocation4 + $0x284] ss:$16 sps:$4 sm:$0xff]  }
  0x5b   :  { %1057 = vmatpush1.bf16.msra.mxu0 %v2506_v54  ;;  %1146 = vmatprep.subr.bf16.mxu1 %v2533_v59  ;;  %v2571_v54 = vld [vmem:[#allocation4 + $0x26c] ss:$16 sps:$4 sm:$0xff]   ;;  %v2572_v59 = vld [vmem:[#allocation4 + $0x280] ss:$16 sps:$4 sm:$0xff]  }
  0x5c   :  { %1058 = vmatprep.subr.bf16.mxu0 %v2514_v56  ;;  %v2569_v56 = vld [vmem:[#allocation4 + $0x268] ss:$16 sps:$4 sm:$0xff]  }
  0x5e   :  { %1147 = vmatpush1.bf16.msra.mxu1 %v2535_v61  ;;  %v2580_v61 = vld [vmem:[#allocation4 + $0x2a4] ss:$16 sps:$4 sm:$0xff]  }
  0x5f   :  { %1059 = vmatpush1.bf16.msra.mxu0 %v2512_v58  ;;  %1148 = vmatprep.subr.bf16.mxu1 %v2539_v5  ;;  %v2577_v58 = vld [vmem:[#allocation4 + $0x28c] ss:$16 sps:$4 sm:$0xff]   ;;  %v2587_v5 = vld [vmem:[#allocation4 + $0x2c8] ss:$16 sps:$4 sm:$0xff]  }
  0x60   :  { %1060 = vmatprep.subr.bf16.mxu0 %v2520_v60  ;;  %v2575_v60 = vld [vmem:[#allocation4 + $0x288] ss:$16 sps:$4 sm:$0xff]  }
  0x62   :  { %1149 = vmatpush1.bf16.msra.mxu1 %v2541_v7  ;;  %v2595_v7 = vld [vmem:[#allocation4 + $0x2ec] ss:$16 sps:$4 sm:$0xff]  }
  0x63   :  { %1061 = vmatpush1.bf16.msra.mxu0 %v2518_v62  ;;  %1150 = vmatprep.subr.bf16.mxu1 %v2545_v9  ;;  %v2583_v62 = vld [vmem:[#allocation4 + $0x2ac] ss:$16 sps:$4 sm:$0xff]   ;;  %v2593_v9 = vld [vmem:[#allocation4 + $0x2e8] ss:$16 sps:$4 sm:$0xff]  }
  0x64   :  { %1062 = vmatprep.subr.bf16.mxu0 %v2526_v63  ;;  %v2578_v63 = vld [vmem:[#allocation4 + $0x2a0] ss:$16 sps:$4 sm:$0xff]  }
  0x66   :  { %1151 = vmatpush1.bf16.msra.mxu1 %v2547_v11  ;;  %v2601_v11 = vld [vmem:[#allocation4 + $0x30c] ss:$16 sps:$4 sm:$0xff]  }
  0x67   :  { %1063 = vmatpush1.bf16.msra.mxu0 %v2524_v1  ;;  %1161 = vmatprep.subr.bf16.mxu1 %v2553_v13  ;;  %v2581_v1 = vld [vmem:[#allocation4 + $0x2a8] ss:$16 sps:$4 sm:$0xff]  }
  0x68   :  { %1064 = vmatprep.subr.bf16.mxu0 %v2532_v2  ;;  %v2586_v2 = vld [vmem:[#allocation4 + $0x2c4] ss:$16 sps:$4 sm:$0xff]   ;;  %v2599_v13 = vld [vmem:[#allocation4 + $0x308] ss:$16 sps:$4 sm:$0xff]  }
  0x6b   :  { %1065 = vmatpush1.bf16.msra.mxu0 %v2530_v3  ;;  %v2589_v3 = vld [vmem:[#allocation4 + $0x2cc] ss:$16 sps:$4 sm:$0xff]  }
  0x6c   :  { %1066 = vmatprep.subr.bf16.mxu0 %v2538_v4  ;;  %v2584_v4 = vld [vmem:[#allocation4 + $0x2c0] ss:$16 sps:$4 sm:$0xff]  }
  0x6f   :  { %1067 = vmatpush1.bf16.msra.mxu0 %v2536_v6  ;;  %v2592_v6 = vld [vmem:[#allocation4 + $0x2e4] ss:$16 sps:$4 sm:$0xff]  }
  0x70   :  { %1068 = vmatprep.subr.bf16.mxu0 %v2544_v8  ;;  %v2590_v8 = vld [vmem:[#allocation4 + $0x2e0] ss:$16 sps:$4 sm:$0xff]  }
  0x73   :  { %1069 = vmatpush1.bf16.msra.mxu0 %v2542_v10  ;;  %v2598_v10 = vld [vmem:[#allocation4 + $0x304] ss:$16 sps:$4 sm:$0xff]  }
  0x74   :  { %1079 = vmatprep.subr.bf16.mxu0 %v2550_v12  ;;  %v2596_v12 = vld [vmem:[#allocation4 + $0x300] ss:$16 sps:$4 sm:$0xff]  }
 0x101   :  { %v184_v21 = vpop.f32.mrb[0].mxu0 }
 0x102   :  { %v185_v22 = vadd.f32 %v184_v21, %v89_v19  ;;  %v186_v23 = vpop.f32.mrb[1].mxu0  ;;  %v2604_v19 = vld [vmem:[#allocation4 + $0x324] ss:$16 sps:$4 sm:$0xff]   ;;  %v2602_v21 = vld [vmem:[#allocation4 + $0x320] ss:$16 sps:$4 sm:$0xff]  }
 0x103   :  { %v187_v24 = vadd.f32 %v186_v23, %v93_v20  ;;  %v188_v25 = vpop.f32.mrb[2].mxu0  ;;  %v2607_v20 = vld [vmem:[#allocation4 + $0x32c] ss:$16 sps:$4 sm:$0xff]   ;;  %v2610_v23 = vld [vmem:[#allocation4 + $0x344] ss:$16 sps:$4 sm:$0xff]  }
 0x104   :  { %vm232_vm1 = vcmp.ge.f32.partialorder %v185_v22, 0.0  ;;  %v236_v27 = vmul.f32 0.2, %v185_v22  ;;  %v189_v28 = vpop.f32.mrb[3].mxu0  ;;  %v2608_v25 = vld [vmem:[#allocation4 + $0x340] ss:$16 sps:$4 sm:$0xff]  }
 0x105   :  { %vm233_vm2 = vcmp.ge.f32.partialorder %v187_v24, 0.0  ;;  %v237_v29 = vmul.f32 0.2, %v187_v24  ;;  %v2616_v28 = vld [vmem:[#allocation4 + $0x364] ss:$16 sps:$4 sm:$0xff]  }
 0x106   :  { %v240_v30 = vsel %vm232_vm1, %v185_v22, %v236_v27  ;;  %v2605_v22 = vld [vmem:[#allocation4 + $0x328] ss:$16 sps:$4 sm:$0xff]   ;;  %vm2136_vm1 = vcmask 56328  }
 0x107   :  { %v241_v31 = vsel %vm233_vm2, %v187_v24, %v237_v29  ;;  %v244_v36 = vpack.c.bf16 %v240_v30, %v240_v30  ;;  %v2613_v24 = vld [vmem:[#allocation4 + $0x34c] ss:$16 sps:$4 sm:$0xff]   ;;  %v2611_v27 = vld [vmem:[#allocation4 + $0x348] ss:$16 sps:$4 sm:$0xff]   ;;  %v2614_v30 = vld [vmem:[#allocation4 + $0x360] ss:$16 sps:$4 sm:$0xff]  }
 0x108   :  { %v245_v33 = vpack.c.bf16 %v241_v31, %v241_v31  ;;  %v2619_v29 = vld [vmem:[#allocation4 + $0x36c] ss:$16 sps:$4 sm:$0xff]   ;;  %v2617_v31 = vld [vmem:[#allocation4 + $0x368] ss:$16 sps:$4 sm:$0xff]  }
 0x109   :  { %v2977_v39 = vpop.f32.mrb[4].mxu0 }
 0x10a   :  { %1070 = vmatprep.mubr.bf16.mxu0 %v245_v33  ;;  %1152 = vmatprep.mubr.bf16.mxu1 %v245_v33  ;;  %v227_v40 = vpop.f32.mrb[5].mxu0  ;;  %v2625_v33 = vld [vmem:[#allocation4 + $0x38c] ss:$16 sps:$4 sm:$0xff]  }
 0x10b   :  { %1071 = vmatmul.mubr.bf16.vlgmr.msra.gmra.mrb[8].mxu0 %v244_v36  ;;  %1153 = vmatmul.mubr.bf16.vlgmr.msra.gmra.mrb[0].mxu1 %v244_v36  ;;  %v228_v42 = vadd.f32 %v227_v40, %v101_v32  ;;  %v229_v43 = vpop.f32.mrb[6].mxu0  ;;  %v2622_v32 = vld [vmem:[#allocation4 + $0x384] ss:$16 sps:$4 sm:$0xff]   ;;  %v2623_v36 = vld [vmem:[#allocation4 + $0x388] ss:$16 sps:$4 sm:$0xff]  }
 0x10c   :  { %1080 = vmatpush1.bf16.msra.mxu0 %v2548_v34  ;;  %1162 = vmatpush1.bf16.msra.mxu1 %v2551_v35  ;;  %v230_v46 = vpop.f32.mrb[7].mxu0  ;;  %v96_v34 = vsub.s32 2, %v2956_v15  ;;  %v2620_v35 = vld [vmem:[#allocation4 + $0x380] ss:$16 sps:$4 sm:$0xff]   ;;  %v2634_v43 = vld [vmem:[#allocation4 + $0x3c4] ss:$16 sps:$4 sm:$0xff]  }
 0x10d   :  { %1081 = vmatprep.subr.bf16.mxu0 %v2556_v37  ;;  %1163 = vmatprep.subr.bf16.mxu1 %v2559_v38  ;;  %vm235_vm3 = vcmp.ge.f32.partialorder %v228_v42, 0.0  ;;  %v239_v48 = vmul.f32 0.2, %v228_v42  ;;  %v2628_v37 = vld [vmem:[#allocation4 + $0x3a4] ss:$16 sps:$4 sm:$0xff]  }
 0x10e   :  { %v2631_v38 = vld [vmem:[#allocation4 + $0x3ac] ss:$16 sps:$4 sm:$0xff]   ;;  %v97_v40 = vrot.slane %v2964_v17, %v96_v34  ;;  %v2632_v46 = vld [vmem:[#allocation4 + $0x3c0] ss:$16 sps:$4 sm:$0xff]  }
 0x10f   :  { %v243_v49 = vsel %vm235_vm3, %v228_v42, %v239_v48  ;;  %v2629_v42 = vld [vmem:[#allocation4 + $0x3a8] ss:$16 sps:$4 sm:$0xff]   ;;  %v2640_v48 = vld [vmem:[#allocation4 + $0x3e4] ss:$16 sps:$4 sm:$0xff]  }
 0x110   :  { %1082 = vmatpush1.bf16.msra.mxu0 %v2554_v41  ;;  %1164 = vmatpush1.bf16.msra.mxu1 %v2557_v44  ;;  %v247_v52 = vpack.c.bf16 %v243_v49, %v243_v49  ;;  %v2626_v41 = vld [vmem:[#allocation4 + $0x3a0] ss:$16 sps:$4 sm:$0xff]   ;;  %v2637_v44 = vld [vmem:[#allocation4 + $0x3cc] ss:$16 sps:$4 sm:$0xff]  }
 0x111   :  { %1083 = vmatprep.subr.bf16.mxu0 %v2562_v45  ;;  %1165 = vmatprep.subr.bf16.mxu1 %v2565_v47  ;;  %v226_v45 = vadd.f32 %v2977_v39, %v97_v40  ;;  %v2635_v47 = vld [vmem:[#allocation4 + $0x3c8] ss:$16 sps:$4 sm:$0xff]   ;;  %v2643_v49 = vld [vmem:[#allocation4 + $0x3ec] ss:$16 sps:$4 sm:$0xff]   ;;  %v1283_v17 = vld [vmem:[%s3345_s7] sm:$0xff] }
 0x112   :  { %1111 = vmatprep.mubr.bf16.mxu0 %v247_v52  ;;  %1193 = vmatprep.mubr.bf16.mxu1 %v247_v52  ;;  %v2641_v52 = vld [vmem:[#allocation4 + $0x3e8] ss:$16 sps:$4 sm:$0xff]   ;;  %v2283_v39 = vcombine.high %v1283_v17, %v1283_v17  ;;  %v2708_v40 = vld [vmem:[%s3344_s6 + $0xa4] ss:$8 sps:$4 sm:$0xff]  }
 0x113   :  { %vm234_vm4 = vcmp.ge.f32.partialorder %v226_v45, 0.0 }
 0x114   :  { %1084 = vmatpush1.bf16.msra.mxu0 %v2560_v50  ;;  %1166 = vmatpush1.bf16.msra.mxu1 %v2563_v51  ;;  %v238_v50 = vmul.f32 0.2, %v226_v45  ;;  %v2638_v51 = vld [vmem:[#allocation4 + $0x3e0] ss:$16 sps:$4 sm:$0xff]  }
 0x115   :  { %1085 = vmatprep.subr.bf16.mxu0 %v2568_v53  ;;  %1167 = vmatprep.subr.bf16.mxu1 %v2571_v54  ;;  %v2282_v53 = vcombine.low %v1283_v17, %v1283_v17  ;;  %v2648_v54 = vld [vmem:[%s3344_s6 + $0x4] ss:$8 sps:$4 sm:$0xff]   ;;  %v2718_v17 = vld [vmem:[%s3344_s6 + $0xc0] ss:$8 sps:$4 sm:$0xff]  }
 0x118   :  { %1086 = vmatpush1.bf16.msra.mxu0 %v2566_v55  ;;  %1168 = vmatpush1.bf16.msra.mxu1 %v2569_v56  ;;  %v242_v55 = vsel %vm234_vm4, %v226_v45, %v238_v50  ;;  %v2703_v45 = vld [vmem:[%s3344_s6 + $0x190] ss:$8 sps:$4 sm:$0xff]   ;;  %v2717_v50 = vld [vmem:[%s3344_s6 + $0x1b4] ss:$8 sps:$4 sm:$0xff]  }
 0x119   :  { %1087 = vmatprep.subr.bf16.mxu0 %v2574_v57  ;;  %1169 = vmatprep.subr.bf16.mxu1 %v2577_v58  ;;  %v246_v56 = vpack.c.bf16 %v242_v55, %v242_v55  ;;  %v1295_v57 = vsel %vm1293_vm5, %v2282_v53, 0  ;;  %v2646_v58 = vld [vmem:[%s3344_s6] ss:$8 sps:$4 sm:$0xff]   ;;  %v2724_v53 = vld [vmem:[%s3344_s6 + $0xd0] ss:$8 sps:$4 sm:$0xff]  }
 0x11a   :  { %v2729_v55 = vld [vmem:[%s3344_s6 + $0x1d4] ss:$8 sps:$4 sm:$0xff]  }
 0x11c   :  { %1088 = vmatpush1.bf16.msra.mxu0 %v2572_v59  ;;  %1170 = vmatpush1.bf16.msra.mxu1 %v2575_v60  ;;  %v2651_v59 = vld [vmem:[%s3344_s6 + $0x104] ss:$8 sps:$4 sm:$0xff]   ;;  %v2654_v60 = vld [vmem:[%s3344_s6 + $0x14] ss:$8 sps:$4 sm:$0xff]  }
 0x11d   :  { %1089 = vmatprep.subr.bf16.mxu0 %v2580_v61  ;;  %1171 = vmatprep.subr.bf16.mxu1 %v2583_v62  ;;  %v74_v61 = vld [vmem:[%s3339_s1] sm:$0xff]  ;;  %v2652_v62 = vld [vmem:[%s3344_s6 + $0x10] ss:$8 sps:$4 sm:$0xff]  }
 0x120   :  { %1090 = vmatpush1.bf16.msra.mxu0 %v2578_v63  ;;  %1172 = vmatpush1.bf16.msra.mxu1 %v2581_v1  ;;  %v2660_v63 = vld [vmem:[%s3344_s6 + $0x24] ss:$8 sps:$4 sm:$0xff]   ;;  %v1282_v1 = vpack.c.bf16 %v74_v61, %v74_v61  ;;  %v2736_v61 = vld [vmem:[%s3344_s6 + $0xf0] ss:$8 sps:$4 sm:$0xff]  }
 0x121   :  { %1091 = vmatprep.subr.bf16.mxu0 %v2586_v2  ;;  %1173 = vmatprep.subr.bf16.mxu1 %v2589_v3  ;;  %v2657_v2 = vld [vmem:[%s3344_s6 + $0x114] ss:$8 sps:$4 sm:$0xff]   ;;  %v2658_v3 = vld [vmem:[%s3344_s6 + $0x20] ss:$8 sps:$4 sm:$0xff]  }
 0x124   :  { %1092 = vmatpush1.bf16.msra.mxu0 %v2584_v4  ;;  %1174 = vmatpush1.bf16.msra.mxu1 %v2587_v5  ;;  %v2666_v4 = vld [vmem:[%s3344_s6 + $0x34] ss:$8 sps:$4 sm:$0xff]   ;;  %v2655_v5 = vld [vmem:[%s3344_s6 + $0x110] ss:$8 sps:$4 sm:$0xff]  }
 0x125   :  { %1093 = vmatprep.subr.bf16.mxu0 %v2592_v6  ;;  %1175 = vmatprep.subr.bf16.mxu1 %v2595_v7  ;;  %v2663_v6 = vld [vmem:[%s3344_s6 + $0x124] ss:$8 sps:$4 sm:$0xff]   ;;  %v2664_v7 = vld [vmem:[%s3344_s6 + $0x30] ss:$8 sps:$4 sm:$0xff]  }
 0x128   :  { %1094 = vmatpush1.bf16.msra.mxu0 %v2590_v8  ;;  %1176 = vmatpush1.bf16.msra.mxu1 %v2593_v9  ;;  %v2672_v8 = vld [vmem:[%s3344_s6 + $0x44] ss:$8 sps:$4 sm:$0xff]   ;;  %v2661_v9 = vld [vmem:[%s3344_s6 + $0x120] ss:$8 sps:$4 sm:$0xff]  }
 0x129   :  { %1095 = vmatprep.subr.bf16.mxu0 %v2598_v10  ;;  %1177 = vmatprep.subr.bf16.mxu1 %v2601_v11  ;;  %v2669_v10 = vld [vmem:[%s3344_s6 + $0x134] ss:$8 sps:$4 sm:$0xff]   ;;  %v2670_v11 = vld [vmem:[%s3344_s6 + $0x40] ss:$8 sps:$4 sm:$0xff]  }
 0x12c   :  { %1096 = vmatpush1.bf16.msra.mxu0 %v2596_v12  ;;  %1178 = vmatpush1.bf16.msra.mxu1 %v2599_v13  ;;  %v2678_v12 = vld [vmem:[%s3344_s6 + $0x54] ss:$8 sps:$4 sm:$0xff]   ;;  %v2667_v13 = vld [vmem:[%s3344_s6 + $0x130] ss:$8 sps:$4 sm:$0xff]  }
 0x12d   :  { %1097 = vmatprep.subr.bf16.mxu0 %v2604_v19  ;;  %1179 = vmatprep.subr.bf16.mxu1 %v2607_v20  ;;  %v2675_v19 = vld [vmem:[%s3344_s6 + $0x144] ss:$8 sps:$4 sm:$0xff]   ;;  %v2676_v20 = vld [vmem:[%s3344_s6 + $0x50] ss:$8 sps:$4 sm:$0xff]  }
 0x130   :  { %1098 = vmatpush1.bf16.msra.mxu0 %v2602_v21  ;;  %1180 = vmatpush1.bf16.msra.mxu1 %v2605_v22  ;;  %v2684_v21 = vld [vmem:[%s3344_s6 + $0x64] ss:$8 sps:$4 sm:$0xff]   ;;  %v2673_v22 = vld [vmem:[%s3344_s6 + $0x140] ss:$8 sps:$4 sm:$0xff]  }
 0x131   :  { %1099 = vmatprep.subr.bf16.mxu0 %v2610_v23  ;;  %1181 = vmatprep.subr.bf16.mxu1 %v2613_v24  ;;  %v2681_v23 = vld [vmem:[%s3344_s6 + $0x154] ss:$8 sps:$4 sm:$0xff]   ;;  %v2682_v24 = vld [vmem:[%s3344_s6 + $0x60] ss:$8 sps:$4 sm:$0xff]  }
 0x134   :  { %1100 = vmatpush1.bf16.msra.mxu0 %v2608_v25  ;;  %1182 = vmatpush1.bf16.msra.mxu1 %v2611_v27  ;;  %v2690_v25 = vld [vmem:[%s3344_s6 + $0x74] ss:$8 sps:$4 sm:$0xff]   ;;  %v2679_v27 = vld [vmem:[%s3344_s6 + $0x150] ss:$8 sps:$4 sm:$0xff]  }
 0x135   :  { %1101 = vmatprep.subr.bf16.mxu0 %v2616_v28  ;;  %1183 = vmatprep.subr.bf16.mxu1 %v2619_v29  ;;  %v2687_v28 = vld [vmem:[%s3344_s6 + $0x164] ss:$8 sps:$4 sm:$0xff]   ;;  %v2688_v29 = vld [vmem:[%s3344_s6 + $0x70] ss:$8 sps:$4 sm:$0xff]  }
 0x138   :  { %1102 = vmatpush1.bf16.msra.mxu0 %v2614_v30  ;;  %1184 = vmatpush1.bf16.msra.mxu1 %v2617_v31  ;;  %v2696_v30 = vld [vmem:[%s3344_s6 + $0x84] ss:$8 sps:$4 sm:$0xff]   ;;  %v2685_v31 = vld [vmem:[%s3344_s6 + $0x160] ss:$8 sps:$4 sm:$0xff]  }
 0x139   :  { %1103 = vmatprep.subr.bf16.mxu0 %v2622_v32  ;;  %1185 = vmatprep.subr.bf16.mxu1 %v2625_v33  ;;  %v2693_v32 = vld [vmem:[%s3344_s6 + $0x174] ss:$8 sps:$4 sm:$0xff]   ;;  %v2694_v33 = vld [vmem:[%s3344_s6 + $0x80] ss:$8 sps:$4 sm:$0xff]  }
 0x13c   :  { %1104 = vmatpush1.bf16.msra.mxu0 %v2620_v35  ;;  %1186 = vmatpush1.bf16.msra.mxu1 %v2623_v36  ;;  %v2702_v35 = vld [vmem:[%s3344_s6 + $0x94] ss:$8 sps:$4 sm:$0xff]   ;;  %v2691_v36 = vld [vmem:[%s3344_s6 + $0x170] ss:$8 sps:$4 sm:$0xff]  }
 0x13d   :  { %1105 = vmatprep.subr.bf16.mxu0 %v2628_v37  ;;  %1187 = vmatprep.subr.bf16.mxu1 %v2631_v38  ;;  %v2699_v37 = vld [vmem:[%s3344_s6 + $0x184] ss:$8 sps:$4 sm:$0xff]   ;;  %v2700_v38 = vld [vmem:[%s3344_s6 + $0x90] ss:$8 sps:$4 sm:$0xff]  }
 0x140   :  { %1106 = vmatpush1.bf16.msra.mxu0 %v2626_v41  ;;  %1188 = vmatpush1.bf16.msra.mxu1 %v2629_v42  ;;  %v2697_v41 = vld [vmem:[%s3344_s6 + $0x180] ss:$8 sps:$4 sm:$0xff]   ;;  %v2705_v42 = vld [vmem:[%s3344_s6 + $0x194] ss:$8 sps:$4 sm:$0xff]  }
 0x141   :  { %1107 = vmatprep.subr.bf16.mxu0 %v2634_v43  ;;  %1189 = vmatprep.subr.bf16.mxu1 %v2637_v44  ;;  %v2706_v43 = vld [vmem:[%s3344_s6 + $0xa0] ss:$8 sps:$4 sm:$0xff]   ;;  %v2714_v44 = vld [vmem:[%s3344_s6 + $0xb4] ss:$8 sps:$4 sm:$0xff]  }
 0x144   :  { %1108 = vmatpush1.bf16.msra.mxu0 %v2632_v46  ;;  %1190 = vmatpush1.bf16.msra.mxu1 %v2635_v47  ;;  %v2711_v46 = vld [vmem:[%s3344_s6 + $0x1a4] ss:$8 sps:$4 sm:$0xff]   ;;  %v2712_v47 = vld [vmem:[%s3344_s6 + $0xb0] ss:$8 sps:$4 sm:$0xff]  }
 0x145   :  { %1109 = vmatprep.subr.bf16.mxu0 %v2640_v48  ;;  %1191 = vmatprep.subr.bf16.mxu1 %v2643_v49  ;;  %v2720_v48 = vld [vmem:[%s3344_s6 + $0xc4] ss:$8 sps:$4 sm:$0xff]   ;;  %v2709_v49 = vld [vmem:[%s3344_s6 + $0x1a0] ss:$8 sps:$4 sm:$0xff]  }
 0x148   :  { %1110 = vmatpush1.bf16.msra.mxu0 %v2638_v51  ;;  %1192 = vmatpush1.bf16.msra.mxu1 %v2641_v52  ;;  %v2726_v51 = vld [vmem:[%s3344_s6 + $0xd4] ss:$8 sps:$4 sm:$0xff]   ;;  %v2715_v52 = vld [vmem:[%s3344_s6 + $0x1b0] ss:$8 sps:$4 sm:$0xff]  }
 0x149   :  { %2284 = vmatprep.subr.msk.bf16.mxu0 %vm1293_vm5, %v2283_v39  ;;  %1661 = vmatprep.subr.bf16.mxu1 %v2648_v54  ;;  %v2723_v39 = vld [vmem:[%s3344_s6 + $0x1c4] ss:$8 sps:$4 sm:$0xff]   ;;  %v2721_v54 = vld [vmem:[%s3344_s6 + $0x1c0] ss:$8 sps:$4 sm:$0xff]  }
 0x14b   :  { %1112 = vmatmul.mubr.bf16.vlgmr.msra.gmra.mrb[8].mxu0 %v246_v56  ;;  %1194 = vmatmul.mubr.bf16.vlgmr.msra.gmra.mrb[0].mxu1 %v246_v56  ;;  %v2727_v56 = vld [vmem:[%s3344_s6 + $0x1d0] ss:$8 sps:$4 sm:$0xff]  }
 0x14c   :  { %1301 = vmatpush1.bf16.msra.mxu0 %v1295_v57  ;;  %1332 = vmatprep.mubr.bf16.mxu0 %v2850_v0  ;;  %v2649_v0 = vld [vmem:[%s3344_s6 + $0x100] ss:$8 sps:$4 sm:$0xff]   ;;  %v2732_v57 = vld [vmem:[%s3344_s6 + $0xe4] ss:$8 sps:$4 sm:$0xff]  }
 0x14d   :  { %1702 = vmatprep.subr.bf16.mxu0 %v2651_v59  ;;  %1662 = vmatpush1.bf16.msra.mxu1 %v2646_v58  ;;  %v2735_v58 = vld [vmem:[%s3344_s6 + $0x1e4] ss:$8 sps:$4 sm:$0xff]   ;;  %v2730_v59 = vld [vmem:[%s3344_s6 + $0xe0] ss:$8 sps:$4 sm:$0xff]  }
 0x14e   :  { %1663 = vmatprep.subr.bf16.mxu1 %v2654_v60  ;;  %v2733_v60 = vld [vmem:[%s3344_s6 + $0x1e0] ss:$8 sps:$4 sm:$0xff]  }
 0x151   :  { %1664 = vmatpush1.bf16.msra.mxu1 %v2652_v62  ;;  %v2738_v62 = vld [vmem:[%s3344_s6 + $0xf4] ss:$8 sps:$4 sm:$0xff]  }
 0x152   :  { %1665 = vmatprep.subr.bf16.mxu1 %v2660_v63  ;;  %v2739_v63 = vld [vmem:[%s3344_s6 + $0x1f0] ss:$8 sps:$4 sm:$0xff]  }
 0x153   :  { %2285 = vmatmul.mubr.msk.bf16.vlgmr.msra.gmra.mrb[12].mxu0 %vm1289_vm6, %v1282_v1  ;;  %v2741_v1 = vld [vmem:[%s3344_s6 + $0x1f4] ss:$8 sps:$4 sm:$0xff]  }
 0x154   :  { %1703 = vmatpush1.bf16.msra.mxu0 %v2649_v0  ;;  %v2744_v0 = vld [vmem:[%s3347_s9 + $0x4] ss:$8 sps:$4 sm:$0xff]  }
 0x155   :  { %1704 = vmatprep.subr.bf16.mxu0 %v2657_v2  ;;  %1666 = vmatpush1.bf16.msra.mxu1 %v2658_v3  ;;  %v376_v2 = vld [vmem:[%s3343_s5] sm:$0xf] }
 0x156   :  { %1667 = vmatprep.subr.bf16.mxu1 %v2666_v4  ;;  %v381_v3 = vrot.slane %v376_v2, %v2959_v16  ;;  %v389_v4 = vrot.slane %v376_v2, %v96_v34 }
 0x158   :  { %1705 = vmatpush1.bf16.msra.mxu0 %v2655_v5  ;;  %v385_v5 = vrot.slane %v376_v2, %v2967_v18 }
 0x159   :  { %1706 = vmatprep.subr.bf16.mxu0 %v2663_v6  ;;  %1668 = vmatpush1.bf16.msra.mxu1 %v2664_v7  ;;  %v393_v6 = vrot.slane %v376_v2, %v100_v26  ;;  %v2784_v2 = vld [vmem:[%s3347_s9 + $0xe0] ss:$8 sps:$4 sm:$0xff]  }
 0x15a   :  { %1669 = vmatprep.subr.bf16.mxu1 %v2672_v8 }
 0x15c   :  { %1707 = vmatpush1.bf16.msra.mxu0 %v2661_v9 }
 0x15d   :  { %1708 = vmatprep.subr.bf16.mxu0 %v2669_v10  ;;  %1670 = vmatpush1.bf16.msra.mxu1 %v2670_v11 }
 0x15e   :  { %1671 = vmatprep.subr.bf16.mxu1 %v2678_v12 }
 0x160   :  { %1709 = vmatpush1.bf16.msra.mxu0 %v2667_v13 }
 0x161   :  { %1710 = vmatprep.subr.bf16.mxu0 %v2675_v19  ;;  %1672 = vmatpush1.bf16.msra.mxu1 %v2676_v20 }
 0x162   :  { %1673 = vmatprep.subr.bf16.mxu1 %v2684_v21 }
 0x164   :  { %1711 = vmatpush1.bf16.msra.mxu0 %v2673_v22 }
 0x165   :  { %1712 = vmatprep.subr.bf16.mxu0 %v2681_v23  ;;  %1674 = vmatpush1.bf16.msra.mxu1 %v2682_v24 }
 0x166   :  { %1675 = vmatprep.subr.bf16.mxu1 %v2690_v25 }
 0x168   :  { %1713 = vmatpush1.bf16.msra.mxu0 %v2679_v27 }
 0x169   :  { %1714 = vmatprep.subr.bf16.mxu0 %v2687_v28  ;;  %1676 = vmatpush1.bf16.msra.mxu1 %v2688_v29 }
 0x16a   :  { %1677 = vmatprep.subr.bf16.mxu1 %v2696_v30 }
 0x16c   :  { %1715 = vmatpush1.bf16.msra.mxu0 %v2685_v31 }
 0x16d   :  { %1716 = vmatprep.subr.bf16.mxu0 %v2693_v32  ;;  %1678 = vmatpush1.bf16.msra.mxu1 %v2694_v33  ;;  %v2742_v32 = vld [vmem:[%s3347_s9] ss:$8 sps:$4 sm:$0xff]  }
 0x16e   :  { %1679 = vmatprep.subr.bf16.mxu1 %v2702_v35 }
 0x170   :  { %1717 = vmatpush1.bf16.msra.mxu0 %v2691_v36 }
 0x171   :  { %1718 = vmatprep.subr.bf16.mxu0 %v2699_v37  ;;  %1680 = vmatpush1.bf16.msra.mxu1 %v2700_v38  ;;  %v2747_v37 = vld [vmem:[%s3347_s9 + $0x14] ss:$8 sps:$4 sm:$0xff]  }
 0x172   :  { %1681 = vmatprep.subr.bf16.mxu1 %v2708_v40 }
 0x174   :  { %1719 = vmatpush1.bf16.msra.mxu0 %v2697_v41 }
 0x175   :  { %1720 = vmatprep.subr.bf16.mxu0 %v2705_v42  ;;  %1682 = vmatpush1.bf16.msra.mxu1 %v2706_v43  ;;  %v2745_v42 = vld [vmem:[%s3347_s9 + $0x10] ss:$8 sps:$4 sm:$0xff]   ;;  %v2750_v43 = vld [vmem:[%s3347_s9 + $0x24] ss:$8 sps:$4 sm:$0xff]  }
 0x176   :  { %1683 = vmatprep.subr.bf16.mxu1 %v2714_v44  ;;  %v2748_v44 = vld [vmem:[%s3347_s9 + $0x20] ss:$8 sps:$4 sm:$0xff]  }
 0x178   :  { %1721 = vmatpush1.bf16.msra.mxu0 %v2703_v45  ;;  %v2753_v45 = vld [vmem:[%s3347_s9 + $0x34] ss:$8 sps:$4 sm:$0xff]  }
 0x179   :  { %1722 = vmatprep.subr.bf16.mxu0 %v2711_v46  ;;  %1684 = vmatpush1.bf16.msra.mxu1 %v2712_v47  ;;  %v2751_v46 = vld [vmem:[%s3347_s9 + $0x30] ss:$8 sps:$4 sm:$0xff]   ;;  %v2756_v47 = vld [vmem:[%s3347_s9 + $0x44] ss:$8 sps:$4 sm:$0xff]  }
 0x17a   :  { %1685 = vmatprep.subr.bf16.mxu1 %v2720_v48  ;;  %v2754_v48 = vld [vmem:[%s3347_s9 + $0x40] ss:$8 sps:$4 sm:$0xff]  }
 0x17c   :  { %1723 = vmatpush1.bf16.msra.mxu0 %v2709_v49  ;;  %v2759_v49 = vld [vmem:[%s3347_s9 + $0x54] ss:$8 sps:$4 sm:$0xff]  }
 0x17d   :  { %1724 = vmatprep.subr.bf16.mxu0 %v2717_v50  ;;  %1686 = vmatpush1.bf16.msra.mxu1 %v2718_v17  ;;  %v2757_v50 = vld [vmem:[%s3347_s9 + $0x50] ss:$8 sps:$4 sm:$0xff]   ;;  %v2762_v17 = vld [vmem:[%s3347_s9 + $0x64] ss:$8 sps:$4 sm:$0xff]  }
 0x17e   :  { %1687 = vmatprep.subr.bf16.mxu1 %v2726_v51  ;;  %v2760_v51 = vld [vmem:[%s3347_s9 + $0x60] ss:$8 sps:$4 sm:$0xff]  }
 0x180   :  { %1725 = vmatpush1.bf16.msra.mxu0 %v2715_v52  ;;  %v2765_v52 = vld [vmem:[%s3347_s9 + $0x74] ss:$8 sps:$4 sm:$0xff]  }
 0x181   :  { %1726 = vmatprep.subr.bf16.mxu0 %v2723_v39  ;;  %1688 = vmatpush1.bf16.msra.mxu1 %v2724_v53  ;;  %v2763_v39 = vld [vmem:[%s3347_s9 + $0x70] ss:$8 sps:$4 sm:$0xff]   ;;  %v2768_v53 = vld [vmem:[%s3347_s9 + $0x84] ss:$8 sps:$4 sm:$0xff]  }
 0x182   :  { %1689 = vmatprep.subr.bf16.mxu1 %v2732_v57  ;;  %v2774_v57 = vld [vmem:[%s3347_s9 + $0xa4] ss:$8 sps:$4 sm:$0xff]  }
 0x184   :  { %1727 = vmatpush1.bf16.msra.mxu0 %v2721_v54  ;;  %v2766_v54 = vld [vmem:[%s3347_s9 + $0x80] ss:$8 sps:$4 sm:$0xff]  }
 0x185   :  { %1728 = vmatprep.subr.bf16.mxu0 %v2729_v55  ;;  %1690 = vmatpush1.bf16.msra.mxu1 %v2730_v59  ;;  %v2771_v55 = vld [vmem:[%s3347_s9 + $0x94] ss:$8 sps:$4 sm:$0xff]  }
 0x186   :  { %1691 = vmatprep.subr.bf16.mxu1 %v2738_v62  ;;  %v2777_v59 = vld [vmem:[%s3347_s9 + $0xb4] ss:$8 sps:$4 sm:$0xff]   ;;  %v2778_v62 = vld [vmem:[%s3347_s9 + $0xc0] ss:$8 sps:$4 sm:$0xff]  }
 0x188   :  { %1729 = vmatpush1.bf16.msra.mxu0 %v2727_v56  ;;  %v2769_v56 = vld [vmem:[%s3347_s9 + $0x90] ss:$8 sps:$4 sm:$0xff]  }
 0x189   :  { %1730 = vmatprep.subr.bf16.mxu0 %v2735_v58  ;;  %1692 = vmatpush1.bf16.msra.mxu1 %v2736_v61  ;;  %v2772_v58 = vld [vmem:[%s3347_s9 + $0xa0] ss:$8 sps:$4 sm:$0xff]   ;;  %v2780_v61 = vld [vmem:[%s3347_s9 + $0xc4] ss:$8 sps:$4 sm:$0xff]  }
 0x18a   :  { %1969 = vmatprep.subr.bf16.mxu1 %v2744_v0  ;;  %v2786_v0 = vld [vmem:[%s3347_s9 + $0xe4] ss:$8 sps:$4 sm:$0xff]  }
 0x18c   :  { %1731 = vmatpush1.bf16.msra.mxu0 %v2733_v60  ;;  %v2775_v60 = vld [vmem:[%s3347_s9 + $0xb0] ss:$8 sps:$4 sm:$0xff]  }
 0x18d   :  { %1732 = vmatprep.subr.bf16.mxu0 %v2741_v1  ;;  %v2781_v1 = vld [vmem:[%s3347_s9 + $0xd0] ss:$8 sps:$4 sm:$0xff]  }
 0x190   :  { %1733 = vmatpush1.bf16.msra.mxu0 %v2739_v63  ;;  %v2783_v63 = vld [vmem:[%s3347_s9 + $0xd4] ss:$8 sps:$4 sm:$0xff]  }
 0x21e   :  { %v1113_v7 = vpop.f32.mrb[8].mxu0  ;;  %v1195_v8 = vpop.f32.mrb[0].mxu1 }
 0x21f   :  { %v2420_v9 = vadd.f32 %v1113_v7, %v381_v3  ;;  %v2422_v10 = vadd.f32 %v1195_v8, %v389_v4  ;;  %v1115_v11 = vpop.f32.mrb[9].mxu0  ;;  %v1197_v12 = vpop.f32.mrb[1].mxu1  ;;  %v2787_v3 = vld [vmem:[%s3347_s9 + $0xf0] ss:$8 sps:$4 sm:$0xff]   ;;  %v2789_v4 = vld [vmem:[%s3347_s9 + $0xf4] ss:$8 sps:$4 sm:$0xff]  }
 0x220   :  { %v2421_v13 = vadd.f32 %v1115_v11, %v385_v5  ;;  %v2423_v19 = vadd.f32 %v1197_v12, %v393_v6  ;;  %v1117_v20 = vpop.f32.mrb[10].mxu0  ;;  %v1199_v21 = vpop.f32.mrb[2].mxu1  ;;  %v2790_v5 = vld [vmem:[%s3349_s11] sm:$0xff]   ;;  %v2851_v6 = vmov 0.0   ;;  %v2791_v7 = vld [vmem:[%s3349_s11 + $0x8] sm:$0xff]   ;;  %v2792_v8 = vld [vmem:[%s3349_s11 + $0x10] sm:$0xff]  }
 0x221   :  { %vm1202_vm7 = vcmp.ge.f32.partialorder %v2420_v9, 0.0  ;;  %v1206_v22 = vmul.f32 0.2, %v2420_v9  ;;  %vm1204_vm8 = vcmp.ge.f32.partialorder %v2422_v10, 0.0  ;;  %v1208_v23 = vmul.f32 0.2, %v2422_v10  ;;  %2400 = vmatprep.subr.bf16.mxu0 %v2851_v6 }
 0x222   :  { %vm1203_vm9 = vcmp.ge.f32.partialorder %v2421_v13, 0.0  ;;  %v1207_v34 = vmul.f32 0.2, %v2421_v13  ;;  %vm1205_vm10 = vcmp.ge.f32.partialorder %v2423_v19, 0.0  ;;  %v1209_v24 = vmul.f32 0.2, %v2423_v19 }
 0x223   :  { %v1210_v15 = vsel %vm1202_vm7, %v2420_v9, %v1206_v22  ;;  %v1212_v26 = vsel %vm1204_vm8, %v2422_v10, %v1208_v23  ;;  %v1118_v25 = vpop.f32.mrb[11].mxu0  ;;  %v1200_v27 = vpop.f32.mrb[3].mxu1  ;;  %v2793_v9 = vld [vmem:[%s3349_s11 + $0x18] sm:$0xff]   ;;  %v2794_v10 = vld [vmem:[%s3349_s11 + $0x20] sm:$0xff]   ;;  %v2795_v11 = vld [vmem:[%s3349_s11 + $0x28] sm:$0xff]  }
 0x224   :  { %v1211_v28 = vsel %vm1203_vm9, %v2421_v13, %v1207_v34  ;;  %v1213_v29 = vsel %vm1205_vm10, %v2423_v19, %v1209_v24  ;;  %v1214_v33 = vpack.c.bf16 %v1210_v15, %v1210_v15  ;;  %v1216_v35 = vpack.c.bf16 %v1212_v26, %v1212_v26  ;;  %v1743_v12 = vld [vmem:[%s3346_s8] sm:$0x3] }
 0x225   :  { %v1215_v30 = vpack.c.bf16 %v1211_v28, %v1211_v28  ;;  %v1217_v31 = vpack.c.bf16 %v1213_v29, %v1213_v29  ;;  %v1748_v21 = vrot.slane %v1743_v12, %v2959_v16  ;;  %v1752_v24 = vrot.slane %v1743_v12, %v2967_v18 }
 0x226   :  { %v3198_v36 = vpop.f32.mrb[12].mxu0 }
 0x227   :  { %1693 = vmatprep.mubr.bf16.mxu1 %v1215_v30  ;;  %1734 = vmatprep.mubr.bf16.mxu0 %v1217_v31  ;;  %v3203_v38 = vpop.f32.mrb[13].mxu0 }
 0x228   :  { %1694 = vmatmul.mubr.bf16.vlgmr.msra.gmra.mrb[4].mxu1 %v1214_v33  ;;  %1735 = vmatmul.mubr.bf16.vlgmr.msra.gmra.mrb[16].mxu0 %v1216_v35  ;;  %v1338_v40 = vpop.f32.mrb[14].mxu0 }
 0x229   :  { %v1339_v41 = vpop.f32.mrb[15].mxu0  ;;  %1970 = vmatpush1.bf16.msra.mxu1 %v2742_v32  ;;  %2401 = vmatpush3.bf16.msra.mxu0 %v2790_v5 }
 0x22a   :  { %1971 = vmatprep.subr.bf16.mxu1 %v2747_v37  ;;  %2402 = vmatprep.subr.bf16.mxu0 %v2851_v6  ;;  %v2797_v41 = vld [vmem:[%s3349_s11 + $0x38] sm:$0xff]  }
 0x22b   :  { %2416 = vmatprep.mubr.msk.bf16.mxu0 %vm2852_vm13, %v2851_v6 }
 0x22d   :  { %1972 = vmatpush1.bf16.msra.mxu1 %v2745_v42  ;;  %2403 = vmatpush3.bf16.msra.mxu0 %v2791_v7  ;;  %v1797_v42 = vld [vmem:[%s3348_s10] sm:$0x3] }
 0x22e   :  { %1973 = vmatprep.subr.bf16.mxu1 %v2750_v43  ;;  %2404 = vmatprep.subr.bf16.mxu0 %v2851_v6  ;;  %v1802_v43 = vrot.slane %v1797_v42, %v2959_v16  ;;  %v2382_v16 = vld [vmem:[%s3350_s12] ss:$0 sm:$0xff] }
 0x231   :  { %1974 = vmatpush1.bf16.msra.mxu1 %v2748_v44  ;;  %2405 = vmatpush3.bf16.msra.mxu0 %v2792_v8  ;;  %v1806_v44 = vrot.slane %v1797_v42, %v2967_v18  ;;  %v2126_v18 = vand.u32 127, %v86_v14 }
 0x232   :  { %1975 = vmatprep.subr.bf16.mxu1 %v2753_v45  ;;  %2406 = vmatprep.subr.bf16.mxu0 %v2851_v6 }
 0x233   :  { %vm2127_vm0 = vcmp.ge.s32.totalorder %v2126_v18, 3 }
 0x235   :  { %1976 = vmatpush1.bf16.msra.mxu1 %v2751_v46  ;;  %2407 = vmatpush3.bf16.msra.mxu0 %v2793_v9 }
 0x236   :  { %1977 = vmatprep.subr.bf16.mxu1 %v2756_v47  ;;  %2408 = vmatprep.subr.bf16.mxu0 %v2851_v6 }
 0x239   :  { %1978 = vmatpush1.bf16.msra.mxu1 %v2754_v48  ;;  %2409 = vmatpush3.bf16.msra.mxu0 %v2794_v10 }
 0x23a   :  { %1979 = vmatprep.subr.bf16.mxu1 %v2759_v49  ;;  %2410 = vmatprep.subr.bf16.mxu0 %v2851_v6 }
 0x23d   :  { %1980 = vmatpush1.bf16.msra.mxu1 %v2757_v50  ;;  %2411 = vmatpush3.bf16.msra.mxu0 %v2795_v11 }
 0x23e   :  { %1981 = vmatprep.subr.bf16.mxu1 %v2762_v17  ;;  %2412 = vmatprep.subr.bf16.mxu0 %v2851_v6 }
 0x241   :  { %1982 = vmatpush1.bf16.msra.mxu1 %v2760_v51 }
 0x242   :  { %1983 = vmatprep.subr.bf16.mxu1 %v2765_v52 }
 0x245   :  { %1984 = vmatpush1.bf16.msra.mxu1 %v2763_v39 }
 0x246   :  { %1985 = vmatprep.subr.bf16.mxu1 %v2768_v53 }
 0x249   :  { %1986 = vmatpush1.bf16.msra.mxu1 %v2766_v54 }
 0x24a   :  { %1987 = vmatprep.subr.bf16.mxu1 %v2771_v55 }
 0x24d   :  { %1988 = vmatpush1.bf16.msra.mxu1 %v2769_v56 }
 0x24e   :  { %1989 = vmatprep.subr.bf16.mxu1 %v2774_v57 }
 0x251   :  { %1990 = vmatpush1.bf16.msra.mxu1 %v2772_v58 }
 0x252   :  { %1991 = vmatprep.subr.bf16.mxu1 %v2777_v59 }
 0x255   :  { %1992 = vmatpush1.bf16.msra.mxu1 %v2775_v60 }
 0x256   :  { %1993 = vmatprep.subr.bf16.mxu1 %v2780_v61 }
 0x259   :  { %1994 = vmatpush1.bf16.msra.mxu1 %v2778_v62 }
 0x25a   :  { %1995 = vmatprep.subr.bf16.mxu1 %v2783_v63 }
 0x25d   :  { %1996 = vmatpush1.bf16.msra.mxu1 %v2781_v1 }
 0x25e   :  { %1997 = vmatprep.subr.bf16.mxu1 %v2786_v0 }
 0x261   :  { %1998 = vmatpush1.bf16.msra.mxu1 %v2784_v2 }
 0x262   :  { %1999 = vmatprep.subr.bf16.mxu1 %v2789_v4 }
 0x265   :  { %2000 = vmatpush1.bf16.msra.mxu1 %v2787_v3 }
 0x2fb   :  { %v1695_v13 = vpop.f32.mrb[4].mxu1  ;;  %v1736_v19 = vpop.f32.mrb[16].mxu0 }
 0x2fc   :  { %v1696_v20 = vadd.f32 %v1695_v13, %v3198_v36  ;;  %v1697_v22 = vpop.f32.mrb[5].mxu1  ;;  %v1738_v23 = vpop.f32.mrb[17].mxu0 }
 0x2fd   :  { %v1698_v34 = vadd.f32 %v1697_v22, %v3203_v38  ;;  %v1699_v15 = vpop.f32.mrb[6].mxu1  ;;  %v1740_v26 = vpop.f32.mrb[18].mxu0  ;;  %v2796_v38 = vld [vmem:[%s3349_s11 + $0x30] sm:$0xff]  }
 0x2fe   :  { %v1737_v25 = vadd.f32 %v1736_v19, %v1696_v20  ;;  %v1700_v27 = vpop.f32.mrb[7].mxu1  ;;  %v1741_v28 = vpop.f32.mrb[19].mxu0  ;;  %2413 = vmatpush3.bf16.msra.mxu0 %v2796_v38 }
 0x2ff   :  { %v1739_v29 = vadd.f32 %v1738_v23, %v1698_v34  ;;  %2414 = vmatprep.subr.bf16.mxu0 %v2851_v6 }
 0x300   :  { %v1755_v30 = vadd.f32 %v1748_v21, %v1737_v25 }
 0x301   :  { %v1756_v31 = vadd.f32 %v1752_v24, %v1739_v29 }
 0x302   :  { %vm1757_vm11 = vcmp.ge.f32.partialorder %v1755_v30, 0.0  ;;  %v1759_v32 = vmul.f32 0.2, %v1755_v30  ;;  %2415 = vmatpush3.bf16.msra.mxu0 %v2797_v41 }
 0x303   :  { %v1760_v33 = vmul.f32 0.2, %v1756_v31  ;;  %vm1758_vm12 = vcmp.ge.f32.partialorder %v1756_v31, 0.0 }
 0x304   :  { %v1761_v35 = vsel %vm1757_vm11, %v1755_v30, %v1759_v32 }
 0x305   :  { %v1762_v36 = vsel %vm1758_vm12, %v1756_v31, %v1760_v33  ;;  %v1763_v40 = vpack.c.bf16 %v1761_v35, %v1761_v35 }
 0x306   :  { %v1764_v37 = vpack.c.bf16 %v1762_v36, %v1762_v36 }
 0x308   :  { %2001 = vmatprep.mubr.bf16.mxu1 %v1764_v37 }
 0x309   :  { %2002 = vmatmul.mubr.bf16.vlgmr.msra.gmra.mrb[8].mxu1 %v1763_v40 }
 0x3dc   :  { %v2003_v45 = vpop.f32.mrb[8].mxu1 }
 0x3dd   :  { %v2004_v46 = vadd.f32 %v2003_v45, %v1802_v43  ;;  %v2005_v47 = vpop.f32.mrb[9].mxu1 }
 0x3de   :  { %v2006_v48 = vadd.f32 %v2005_v47, %v1806_v44  ;;  %v2007_v49 = vpop.f32.mrb[10].mxu1 }
 0x3df   :  { %vm2010_vm15 = vcmp.ge.f32.partialorder %v2004_v46, 0.0  ;;  %v2011_v50 = vmul.f32 0.2, %v2004_v46  ;;  %v2008_v17 = vpop.f32.mrb[11].mxu1 }
 0x3e0   :  { %2131 = vst.msk [vmem:[%s3351_s13] sm:$0xff] %vm2130_vm14, %v2006_v48 }
 0x3e1   :  { %v2012_v51 = vsel %vm2010_vm15, %v2004_v46, %v2011_v50 }
 0x3e2   :  { %v2013_v52 = vpack.c.bf16 %v2012_v51, %v2012_v51 }
 0x3e4   :  { %2417 = vmatmul.mubr.bf16.vlgmr.msra.gmra.mrb[20].mxu0 %v2013_v52 }
 0x4b7   :  { %v2119_v39 = vpop.f32.mrb[20].mxu0 }
 0x4b8   :  { %v2120_v53 = vadd.f32 %v2382_v16, %v2119_v39  ;;  %v2418_v54 = vpop.f32.mrb[21].mxu0 }
 0x4b9   :  { %v2122_v55 = vpop.f32.mrb[22].mxu0 }
 0x4ba   :  { %v2128_v56 = vmax.f32 %v2120_v53, -16.0  ;;  %v2419_v57 = vpop.f32.mrb[23].mxu0 }
 0x4bc   :  { %v2129_v58 = vsel %vm2127_vm0, %v2128_v56, %v2120_v53 }
 0x4bd   :  { %2133 = vrot.lane.b32.xlu0 %v2129_v58, %s2853_s20 }
 0x52f   :  { %v2134_v59 = vpop.permute.xlu0 %2133 }
 0x530   :  { %2137 = vst.msk [vmem:[%s3351_s13] sm:$0xff] %vm2136_vm1, %v2134_v59 }
 0x531   :  { %2142 = vsyncpa [#allocation3], 1 }
 0x532   :  { %2143 = vsyncpa [#allocation5], 1 }

</bundles_post_ra>
